<compile_context>
chip_gen: v7x
topology: tpu7x:2x2x1
jax: 0.10.0
libtpu: 0.0.40
codegen_flags: <defaults>
</compile_context>

<pallas_src>
import math

import jax
import jax.numpy as jnp
from jax import lax
from jax.experimental import pallas as pl
from jax.experimental.pallas import tpu as pltpu

_GELU_C = math.sqrt(2.0 / math.pi)
_GELU_C2 = _GELU_C * 0.044715
_R = 30                      # rows of proj_1 / proj_2 (fixed by the module)
_OUT = _R * _R               # 900
_COL_CHUNK = 128             # lane-aligned column chunk (900 = 7*128 + 4)
_ROW_SUB = 128               # row sub-tile: two (128,128) f32 dot results ~32 vregs


def _gelu_tanh(x):
    # 0.5*x*(1+tanh(sqrt(2/pi)*(x+0.044715*x^3))) with x*x reused (fewer VALU ops).
    return 0.5 * x * (1.0 + jnp.tanh(x * (_GELU_C + _GELU_C2 * (x * x))))


def _attention_kernel(h_ref, x3_ref, w1_ref, w2_ref, out_ref):
    # h:  (TN, m)    x3: (TN, n)
    # w1: (m, 900)   w2: (n, 900)     out: (TN, 900)
    tn = out_ref.shape[0]
    # Static two-level tiling: every slice is a 128-aligned static view
    # (zero cost) and every store a dense vst, except the tiny 4-wide tail.
    for r0 in range(0, tn, _ROW_SUB):
        rows = min(_ROW_SUB, tn - r0)
        h = h_ref[r0:r0 + rows, :]       # few vregs, held across the column loop
        x3 = x3_ref[r0:r0 + rows, :]
        for c0 in range(0, _OUT, _COL_CHUNK):
            cols = min(_COL_CHUNK, _OUT - c0)
            p1 = jnp.dot(h, w1_ref[:, c0:c0 + cols],
                         preferred_element_type=jnp.float32,
                         precision=lax.Precision.HIGHEST)
            p2 = jnp.dot(x3, w2_ref[:, c0:c0 + cols],
                         preferred_element_type=jnp.float32,
                         precision=lax.Precision.HIGHEST)
            out_ref[r0:r0 + rows, c0:c0 + cols] = _gelu_tanh(p1 * p2).astype(
                out_ref.dtype)


def attention_forward(input1, input2, input3, proj_1, proj_2, *, block_n=512):
    """Pallas equivalent of Attention.forward -> (N, 900) float32."""
    N, d1 = input1.shape
    d2 = input2.shape[1]
    n = input3.shape[1]
    m = proj_1.shape[1]
    assert d1 + d2 == m, f"d1+d2 ({d1}+{d2}) must equal m ({m})"
    assert proj_1.shape == (_R, m)
    assert proj_2.shape == (_R, n)

    # Fuse torch.cat in the wrapper (one tiny XLA op, (d1+d2)*4 B/row).
    h = jnp.concatenate([input1, input2], axis=-1)          # (N, m)

    # Trace-time expanded / pre-transposed weights.
    w1e = jnp.repeat(proj_1.T, _R, axis=1)                  # (m, 900)
    w2e = jnp.tile(proj_2.T, (1, _R))                       # (n, 900)

    tn = min(block_n, N)                                    # batch tile (rows)
    grid = (pl.cdiv(N, tn),)

    cost = pl.CostEstimate(
        flops=2 * N * _OUT * (m + n) + 10 * N * _OUT,
        transcendentals=N * _OUT,                           # one tanh per output
        bytes_accessed=4 * (N * (m + n + n) + (m + n) * _OUT + N * _OUT),
    )

    out = pl.pallas_call(
        _attention_kernel,
        out_shape=jax.ShapeDtypeStruct((N, _OUT), jnp.float32),
        grid_spec=pltpu.PrefetchScalarGridSpec(
            num_scalar_prefetch=0,
            grid=grid,
            in_specs=[
                pl.BlockSpec((tn, m), lambda i: (i, 0)),
                pl.BlockSpec((tn, n), lambda i: (i, 0)),
                # Constant block index -> weights DMA'd only once across the grid.
                pl.BlockSpec((m, _OUT), lambda i: (0, 0)),
                pl.BlockSpec((n, _OUT), lambda i: (0, 0)),
            ],
            out_specs=pl.BlockSpec((tn, _OUT), lambda i: (i, 0)),
        ),
        compiler_params=pltpu.CompilerParams(
            dimension_semantics=("parallel",),   # shard batch tiles across TCs on v7x
        ),
        cost_estimate=cost,
    )(h, input3, w1e, w2e)
    return out


def init_params(key, m, n):
    """Deterministic init matching reset_parameters (uniform(-1/sqrt(dim), 1/sqrt(dim)))."""
    k1, k2 = jax.random.split(key)
    stdv1 = 1.0 / math.sqrt(m)
    stdv2 = 1.0 / math.sqrt(n)
    proj_1 = jax.random.uniform(k1, (_R, m), jnp.float32, -stdv1, stdv1)
    proj_2 = jax.random.uniform(k2, (_R, n), jnp.float32, -stdv2, stdv2)
    return proj_1, proj_2


if __name__ == "__main__":
    # Small shapes consistent with the module: m = d1 + d2, arbitrary n.
    N, d1, d2, n = 8, 16, 16, 32
    m = d1 + d2

    key = jax.random.PRNGKey(0)
    kp, k1, k2, k3 = jax.random.split(key, 4)

    proj_1, proj_2 = init_params(kp, m, n)
    input1 = jax.random.normal(k1, (N, d1), jnp.float32)
    input2 = jax.random.normal(k2, (N, d2), jnp.float32)
    input3 = jax.random.normal(k3, (N, n), jnp.float32)

    out = jax.block_until_ready(
        attention_forward(input1, input2, input3, proj_1, proj_2))

    # Pure-JAX reference (matches the PyTorch forward; same matmul precision
    # as the kernel so the comparison is meaningful on real TPU hardware).
    h_ref = jnp.concatenate([input1, input2], axis=-1)
    p1_ref = jnp.dot(h_ref, proj_1.T, precision=lax.Precision.HIGHEST)
    p2_ref = jnp.dot(input3, proj_2.T, precision=lax.Precision.HIGHEST)
    ref = _gelu_tanh((p1_ref[:, :, None] * p2_ref[:, None, :]).reshape(N, -1))

    assert out.shape == (N, _OUT), out.shape
    max_err = float(jnp.max(jnp.abs(out - ref)))
    assert jnp.allclose(out, ref, atol=1e-4, rtol=1e-4), f"mismatch, max_err={max_err}"

    print("KERNEL_OK")
</pallas_src>

<mosaic_0001>
module attributes {stable_mosaic.version = 11 : i64} {
  func.func @_attention_kernel(%arg0: i32, %arg1: memref<8x32xf32, #tpu.memory_space<vmem>>, %arg2: memref<8x32xf32, #tpu.memory_space<vmem>>, %arg3: memref<32x900xf32, #tpu.memory_space<vmem>>, %arg4: memref<32x900xf32, #tpu.memory_space<vmem>>, %arg5: memref<8x900xf32, #tpu.memory_space<vmem>>) attributes {dimension_semantics = [#tpu.dimension_semantics<parallel>], iteration_bounds = array<i64: 1>, scalar_prefetch = 0 : i64, scratch_operands = 0 : i64, tpu.core_type = #tpu.core_type<tc>, window_params = [{transform_indices = @transform_0, window_bounds = array<i64: 8, 32>}, {transform_indices = @transform_1, window_bounds = array<i64: 8, 32>}, {pipeline_mode = #tpu.pipeline_mode<synchronous>, transform_indices = @transform_2, window_bounds = array<i64: 32, 900>}, {pipeline_mode = #tpu.pipeline_mode<synchronous>, transform_indices = @transform_3, window_bounds = array<i64: 32, 900>}, {transform_indices = @transform_4, window_bounds = array<i64: 8, 900>}]} {
    %c0 = arith.constant 0 : index
    %c0_0 = arith.constant 0 : index
    %0 = vector.load %arg1[%c0, %c0_0] : memref<8x32xf32, #tpu.memory_space<vmem>>, vector<8x32xf32>
    %c0_1 = arith.constant 0 : index
    %c0_2 = arith.constant 0 : index
    %1 = vector.load %arg2[%c0_1, %c0_2] : memref<8x32xf32, #tpu.memory_space<vmem>>, vector<8x32xf32>
    %c0_3 = arith.constant 0 : index
    %c0_4 = arith.constant 0 : index
    %2 = vector.load %arg3[%c0_3, %c0_4] : memref<32x900xf32, #tpu.memory_space<vmem>>, vector<32x128xf32>
    %cst = arith.constant dense<0.000000e+00> : vector<8x128xf32>
    %3 = tpu.matmul %0, %2, %cst {dimension_numbers = #tpu.dot_dimension_numbers<[1], [0], [0], [1], [0, 0, 1, 1], [], []>, precision = #tpu.contract_precision<fp32>} : vector<8x32xf32>, vector<32x128xf32>, vector<8x128xf32> -> vector<8x128xf32>
    %c0_5 = arith.constant 0 : index
    %c0_6 = arith.constant 0 : index
    %4 = vector.load %arg4[%c0_5, %c0_6] : memref<32x900xf32, #tpu.memory_space<vmem>>, vector<32x128xf32>
    %cst_7 = arith.constant dense<0.000000e+00> : vector<8x128xf32>
    %5 = tpu.matmul %1, %4, %cst_7 {dimension_numbers = #tpu.dot_dimension_numbers<[1], [0], [0], [1], [0, 0, 1, 1], [], []>, precision = #tpu.contract_precision<fp32>} : vector<8x32xf32>, vector<32x128xf32>, vector<8x128xf32> -> vector<8x128xf32>
    %6 = arith.mulf %3, %5 : vector<8x128xf32>
    %cst_8 = arith.constant 5.000000e-01 : f32
    %7 = vector.broadcast %cst_8 : f32 to vector<8x128xf32>
    %8 = arith.mulf %7, %6 : vector<8x128xf32>
    %9 = arith.mulf %6, %6 : vector<8x128xf32>
    %cst_9 = arith.constant 0.0356774069 : f32
    %10 = vector.broadcast %cst_9 : f32 to vector<8x128xf32>
    %11 = arith.mulf %10, %9 : vector<8x128xf32>
    %cst_10 = arith.constant 0.797884583 : f32
    %12 = vector.broadcast %cst_10 : f32 to vector<8x128xf32>
    %13 = arith.addf %12, %11 : vector<8x128xf32>
    %14 = arith.mulf %6, %13 : vector<8x128xf32>
    %15 = math.tanh %14 : vector<8x128xf32>
    %cst_11 = arith.constant 1.000000e+00 : f32
    %16 = vector.broadcast %cst_11 : f32 to vector<8x128xf32>
    %17 = arith.addf %16, %15 : vector<8x128xf32>
    %18 = arith.mulf %8, %17 : vector<8x128xf32>
    %c0_12 = arith.constant 0 : index
    %c0_13 = arith.constant 0 : index
    %19 = vector.load %arg5[%c0_12, %c0_13] : memref<8x900xf32, #tpu.memory_space<vmem>>, vector<8x128xf32>
    tpu.vector_store %arg5[%c0_12, %c0_13], %18 {strides = array<i32>} : memref<8x900xf32, #tpu.memory_space<vmem>>, vector<8x128xf32>,
    %c0_14 = arith.constant 0 : index
    %c128 = arith.constant 128 : index
    %20 = vector.load %arg3[%c0_14, %c128] : memref<32x900xf32, #tpu.memory_space<vmem>>, vector<32x128xf32>
    %cst_15 = arith.constant dense<0.000000e+00> : vector<8x128xf32>
    %21 = tpu.matmul %0, %20, %cst_15 {dimension_numbers = #tpu.dot_dimension_numbers<[1], [0], [0], [1], [0, 0, 1, 1], [], []>, precision = #tpu.contract_precision<fp32>} : vector<8x32xf32>, vector<32x128xf32>, vector<8x128xf32> -> vector<8x128xf32>
    %c0_16 = arith.constant 0 : index
    %c128_17 = arith.constant 128 : index
    %22 = vector.load %arg4[%c0_16, %c128_17] : memref<32x900xf32, #tpu.memory_space<vmem>>, vector<32x128xf32>
    %cst_18 = arith.constant dense<0.000000e+00> : vector<8x128xf32>
    %23 = tpu.matmul %1, %22, %cst_18 {dimension_numbers = #tpu.dot_dimension_numbers<[1], [0], [0], [1], [0, 0, 1, 1], [], []>, precision = #tpu.contract_precision<fp32>} : vector<8x32xf32>, vector<32x128xf32>, vector<8x128xf32> -> vector<8x128xf32>
    %24 = arith.mulf %21, %23 : vector<8x128xf32>
    %cst_19 = arith.constant 5.000000e-01 : f32
    %25 = vector.broadcast %cst_19 : f32 to vector<8x128xf32>
    %26 = arith.mulf %25, %24 : vector<8x128xf32>
    %27 = arith.mulf %24, %24 : vector<8x128xf32>
    %cst_20 = arith.constant 0.0356774069 : f32
    %28 = vector.broadcast %cst_20 : f32 to vector<8x128xf32>
    %29 = arith.mulf %28, %27 : vector<8x128xf32>
    %cst_21 = arith.constant 0.797884583 : f32
    %30 = vector.broadcast %cst_21 : f32 to vector<8x128xf32>
    %31 = arith.addf %30, %29 : vector<8x128xf32>
    %32 = arith.mulf %24, %31 : vector<8x128xf32>
    %33 = math.tanh %32 : vector<8x128xf32>
    %cst_22 = arith.constant 1.000000e+00 : f32
    %34 = vector.broadcast %cst_22 : f32 to vector<8x128xf32>
    %35 = arith.addf %34, %33 : vector<8x128xf32>
    %36 = arith.mulf %26, %35 : vector<8x128xf32>
    %c0_23 = arith.constant 0 : index
    %c128_24 = arith.constant 128 : index
    %37 = vector.load %arg5[%c0_23, %c128_24] : memref<8x900xf32, #tpu.memory_space<vmem>>, vector<8x128xf32>
    tpu.vector_store %arg5[%c0_23, %c128_24], %36 {strides = array<i32>} : memref<8x900xf32, #tpu.memory_space<vmem>>, vector<8x128xf32>,
    %c0_25 = arith.constant 0 : index
    %c256 = arith.constant 256 : index
    %38 = vector.load %arg3[%c0_25, %c256] : memref<32x900xf32, #tpu.memory_space<vmem>>, vector<32x128xf32>
    %cst_26 = arith.constant dense<0.000000e+00> : vector<8x128xf32>
    %39 = tpu.matmul %0, %38, %cst_26 {dimension_numbers = #tpu.dot_dimension_numbers<[1], [0], [0], [1], [0, 0, 1, 1], [], []>, precision = #tpu.contract_precision<fp32>} : vector<8x32xf32>, vector<32x128xf32>, vector<8x128xf32> -> vector<8x128xf32>
    %c0_27 = arith.constant 0 : index
    %c256_28 = arith.constant 256 : index
    %40 = vector.load %arg4[%c0_27, %c256_28] : memref<32x900xf32, #tpu.memory_space<vmem>>, vector<32x128xf32>
    %cst_29 = arith.constant dense<0.000000e+00> : vector<8x128xf32>
    %41 = tpu.matmul %1, %40, %cst_29 {dimension_numbers = #tpu.dot_dimension_numbers<[1], [0], [0], [1], [0, 0, 1, 1], [], []>, precision = #tpu.contract_precision<fp32>} : vector<8x32xf32>, vector<32x128xf32>, vector<8x128xf32> -> vector<8x128xf32>
    %42 = arith.mulf %39, %41 : vector<8x128xf32>
    %cst_30 = arith.constant 5.000000e-01 : f32
    %43 = vector.broadcast %cst_30 : f32 to vector<8x128xf32>
    %44 = arith.mulf %43, %42 : vector<8x128xf32>
    %45 = arith.mulf %42, %42 : vector<8x128xf32>
    %cst_31 = arith.constant 0.0356774069 : f32
    %46 = vector.broadcast %cst_31 : f32 to vector<8x128xf32>
    %47 = arith.mulf %46, %45 : vector<8x128xf32>
    %cst_32 = arith.constant 0.797884583 : f32
    %48 = vector.broadcast %cst_32 : f32 to vector<8x128xf32>
    %49 = arith.addf %48, %47 : vector<8x128xf32>
    %50 = arith.mulf %42, %49 : vector<8x128xf32>
    %51 = math.tanh %50 : vector<8x128xf32>
    %cst_33 = arith.constant 1.000000e+00 : f32
    %52 = vector.broadcast %cst_33 : f32 to vector<8x128xf32>
    %53 = arith.addf %52, %51 : vector<8x128xf32>
    %54 = arith.mulf %44, %53 : vector<8x128xf32>
    %c0_34 = arith.constant 0 : index
    %c256_35 = arith.constant 256 : index
    %55 = vector.load %arg5[%c0_34, %c256_35] : memref<8x900xf32, #tpu.memory_space<vmem>>, vector<8x128xf32>
    tpu.vector_store %arg5[%c0_34, %c256_35], %54 {strides = array<i32>} : memref<8x900xf32, #tpu.memory_space<vmem>>, vector<8x128xf32>,
    %c0_36 = arith.constant 0 : index
    %c384 = arith.constant 384 : index
    %56 = vector.load %arg3[%c0_36, %c384] : memref<32x900xf32, #tpu.memory_space<vmem>>, vector<32x128xf32>
    %cst_37 = arith.constant dense<0.000000e+00> : vector<8x128xf32>
    %57 = tpu.matmul %0, %56, %cst_37 {dimension_numbers = #tpu.dot_dimension_numbers<[1], [0], [0], [1], [0, 0, 1, 1], [], []>, precision = #tpu.contract_precision<fp32>} : vector<8x32xf32>, vector<32x128xf32>, vector<8x128xf32> -> vector<8x128xf32>
    %c0_38 = arith.constant 0 : index
    %c384_39 = arith.constant 384 : index
    %58 = vector.load %arg4[%c0_38, %c384_39] : memref<32x900xf32, #tpu.memory_space<vmem>>, vector<32x128xf32>
    %cst_40 = arith.constant dense<0.000000e+00> : vector<8x128xf32>
    %59 = tpu.matmul %1, %58, %cst_40 {dimension_numbers = #tpu.dot_dimension_numbers<[1], [0], [0], [1], [0, 0, 1, 1], [], []>, precision = #tpu.contract_precision<fp32>} : vector<8x32xf32>, vector<32x128xf32>, vector<8x128xf32> -> vector<8x128xf32>
    %60 = arith.mulf %57, %59 : vector<8x128xf32>
    %cst_41 = arith.constant 5.000000e-01 : f32
    %61 = vector.broadcast %cst_41 : f32 to vector<8x128xf32>
    %62 = arith.mulf %61, %60 : vector<8x128xf32>
    %63 = arith.mulf %60, %60 : vector<8x128xf32>
    %cst_42 = arith.constant 0.0356774069 : f32
    %64 = vector.broadcast %cst_42 : f32 to vector<8x128xf32>
    %65 = arith.mulf %64, %63 : vector<8x128xf32>
    %cst_43 = arith.constant 0.797884583 : f32
    %66 = vector.broadcast %cst_43 : f32 to vector<8x128xf32>
    %67 = arith.addf %66, %65 : vector<8x128xf32>
    %68 = arith.mulf %60, %67 : vector<8x128xf32>
    %69 = math.tanh %68 : vector<8x128xf32>
    %cst_44 = arith.constant 1.000000e+00 : f32
    %70 = vector.broadcast %cst_44 : f32 to vector<8x128xf32>
    %71 = arith.addf %70, %69 : vector<8x128xf32>
    %72 = arith.mulf %62, %71 : vector<8x128xf32>
    %c0_45 = arith.constant 0 : index
    %c384_46 = arith.constant 384 : index
    %73 = vector.load %arg5[%c0_45, %c384_46] : memref<8x900xf32, #tpu.memory_space<vmem>>, vector<8x128xf32>
    tpu.vector_store %arg5[%c0_45, %c384_46], %72 {strides = array<i32>} : memref<8x900xf32, #tpu.memory_space<vmem>>, vector<8x128xf32>,
    %c0_47 = arith.constant 0 : index
    %c512 = arith.constant 512 : index
    %74 = vector.load %arg3[%c0_47, %c512] : memref<32x900xf32, #tpu.memory_space<vmem>>, vector<32x128xf32>
    %cst_48 = arith.constant dense<0.000000e+00> : vector<8x128xf32>
    %75 = tpu.matmul %0, %74, %cst_48 {dimension_numbers = #tpu.dot_dimension_numbers<[1], [0], [0], [1], [0, 0, 1, 1], [], []>, precision = #tpu.contract_precision<fp32>} : vector<8x32xf32>, vector<32x128xf32>, vector<8x128xf32> -> vector<8x128xf32>
    %c0_49 = arith.constant 0 : index
    %c512_50 = arith.constant 512 : index
    %76 = vector.load %arg4[%c0_49, %c512_50] : memref<32x900xf32, #tpu.memory_space<vmem>>, vector<32x128xf32>
    %cst_51 = arith.constant dense<0.000000e+00> : vector<8x128xf32>
    %77 = tpu.matmul %1, %76, %cst_51 {dimension_numbers = #tpu.dot_dimension_numbers<[1], [0], [0], [1], [0, 0, 1, 1], [], []>, precision = #tpu.contract_precision<fp32>} : vector<8x32xf32>, vector<32x128xf32>, vector<8x128xf32> -> vector<8x128xf32>
    %78 = arith.mulf %75, %77 : vector<8x128xf32>
    %cst_52 = arith.constant 5.000000e-01 : f32
    %79 = vector.broadcast %cst_52 : f32 to vector<8x128xf32>
    %80 = arith.mulf %79, %78 : vector<8x128xf32>
    %81 = arith.mulf %78, %78 : vector<8x128xf32>
    %cst_53 = arith.constant 0.0356774069 : f32
    %82 = vector.broadcast %cst_53 : f32 to vector<8x128xf32>
    %83 = arith.mulf %82, %81 : vector<8x128xf32>
    %cst_54 = arith.constant 0.797884583 : f32
    %84 = vector.broadcast %cst_54 : f32 to vector<8x128xf32>
    %85 = arith.addf %84, %83 : vector<8x128xf32>
    %86 = arith.mulf %78, %85 : vector<8x128xf32>
    %87 = math.tanh %86 : vector<8x128xf32>
    %cst_55 = arith.constant 1.000000e+00 : f32
    %88 = vector.broadcast %cst_55 : f32 to vector<8x128xf32>
    %89 = arith.addf %88, %87 : vector<8x128xf32>
    %90 = arith.mulf %80, %89 : vector<8x128xf32>
    %c0_56 = arith.constant 0 : index
    %c512_57 = arith.constant 512 : index
    %91 = vector.load %arg5[%c0_56, %c512_57] : memref<8x900xf32, #tpu.memory_space<vmem>>, vector<8x128xf32>
    tpu.vector_store %arg5[%c0_56, %c512_57], %90 {strides = array<i32>} : memref<8x900xf32, #tpu.memory_space<vmem>>, vector<8x128xf32>,
    %c0_58 = arith.constant 0 : index
    %c640 = arith.constant 640 : index
    %92 = vector.load %arg3[%c0_58, %c640] : memref<32x900xf32, #tpu.memory_space<vmem>>, vector<32x128xf32>
    %cst_59 = arith.constant dense<0.000000e+00> : vector<8x128xf32>
    %93 = tpu.matmul %0, %92, %cst_59 {dimension_numbers = #tpu.dot_dimension_numbers<[1], [0], [0], [1], [0, 0, 1, 1], [], []>, precision = #tpu.contract_precision<fp32>} : vector<8x32xf32>, vector<32x128xf32>, vector<8x128xf32> -> vector<8x128xf32>
    %c0_60 = arith.constant 0 : index
    %c640_61 = arith.constant 640 : index
    %94 = vector.load %arg4[%c0_60, %c640_61] : memref<32x900xf32, #tpu.memory_space<vmem>>, vector<32x128xf32>
    %cst_62 = arith.constant dense<0.000000e+00> : vector<8x128xf32>
    %95 = tpu.matmul %1, %94, %cst_62 {dimension_numbers = #tpu.dot_dimension_numbers<[1], [0], [0], [1], [0, 0, 1, 1], [], []>, precision = #tpu.contract_precision<fp32>} : vector<8x32xf32>, vector<32x128xf32>, vector<8x128xf32> -> vector<8x128xf32>
    %96 = arith.mulf %93, %95 : vector<8x128xf32>
    %cst_63 = arith.constant 5.000000e-01 : f32
    %97 = vector.broadcast %cst_63 : f32 to vector<8x128xf32>
    %98 = arith.mulf %97, %96 : vector<8x128xf32>
    %99 = arith.mulf %96, %96 : vector<8x128xf32>
    %cst_64 = arith.constant 0.0356774069 : f32
    %100 = vector.broadcast %cst_64 : f32 to vector<8x128xf32>
    %101 = arith.mulf %100, %99 : vector<8x128xf32>
    %cst_65 = arith.constant 0.797884583 : f32
    %102 = vector.broadcast %cst_65 : f32 to vector<8x128xf32>
    %103 = arith.addf %102, %101 : vector<8x128xf32>
    %104 = arith.mulf %96, %103 : vector<8x128xf32>
    %105 = math.tanh %104 : vector<8x128xf32>
    %cst_66 = arith.constant 1.000000e+00 : f32
    %106 = vector.broadcast %cst_66 : f32 to vector<8x128xf32>
    %107 = arith.addf %106, %105 : vector<8x128xf32>
    %108 = arith.mulf %98, %107 : vector<8x128xf32>
    %c0_67 = arith.constant 0 : index
    %c640_68 = arith.constant 640 : index
    %109 = vector.load %arg5[%c0_67, %c640_68] : memref<8x900xf32, #tpu.memory_space<vmem>>, vector<8x128xf32>
    tpu.vector_store %arg5[%c0_67, %c640_68], %108 {strides = array<i32>} : memref<8x900xf32, #tpu.memory_space<vmem>>, vector<8x128xf32>,
    %c0_69 = arith.constant 0 : index
    %c768 = arith.constant 768 : index
    %110 = vector.load %arg3[%c0_69, %c768] : memref<32x900xf32, #tpu.memory_space<vmem>>, vector<32x128xf32>
    %cst_70 = arith.constant dense<0.000000e+00> : vector<8x128xf32>
    %111 = tpu.matmul %0, %110, %cst_70 {dimension_numbers = #tpu.dot_dimension_numbers<[1], [0], [0], [1], [0, 0, 1, 1], [], []>, precision = #tpu.contract_precision<fp32>} : vector<8x32xf32>, vector<32x128xf32>, vector<8x128xf32> -> vector<8x128xf32>
    %c0_71 = arith.constant 0 : index
    %c768_72 = arith.constant 768 : index
    %112 = vector.load %arg4[%c0_71, %c768_72] : memref<32x900xf32, #tpu.memory_space<vmem>>, vector<32x128xf32>
    %cst_73 = arith.constant dense<0.000000e+00> : vector<8x128xf32>
    %113 = tpu.matmul %1, %112, %cst_73 {dimension_numbers = #tpu.dot_dimension_numbers<[1], [0], [0], [1], [0, 0, 1, 1], [], []>, precision = #tpu.contract_precision<fp32>} : vector<8x32xf32>, vector<32x128xf32>, vector<8x128xf32> -> vector<8x128xf32>
    %114 = arith.mulf %111, %113 : vector<8x128xf32>
    %cst_74 = arith.constant 5.000000e-01 : f32
    %115 = vector.broadcast %cst_74 : f32 to vector<8x128xf32>
    %116 = arith.mulf %115, %114 : vector<8x128xf32>
    %117 = arith.mulf %114, %114 : vector<8x128xf32>
    %cst_75 = arith.constant 0.0356774069 : f32
    %118 = vector.broadcast %cst_75 : f32 to vector<8x128xf32>
    %119 = arith.mulf %118, %117 : vector<8x128xf32>
    %cst_76 = arith.constant 0.797884583 : f32
    %120 = vector.broadcast %cst_76 : f32 to vector<8x128xf32>
    %121 = arith.addf %120, %119 : vector<8x128xf32>
    %122 = arith.mulf %114, %121 : vector<8x128xf32>
    %123 = math.tanh %122 : vector<8x128xf32>
    %cst_77 = arith.constant 1.000000e+00 : f32
    %124 = vector.broadcast %cst_77 : f32 to vector<8x128xf32>
    %125 = arith.addf %124, %123 : vector<8x128xf32>
    %126 = arith.mulf %116, %125 : vector<8x128xf32>
    %c0_78 = arith.constant 0 : index
    %c768_79 = arith.constant 768 : index
    %127 = vector.load %arg5[%c0_78, %c768_79] : memref<8x900xf32, #tpu.memory_space<vmem>>, vector<8x128xf32>
    tpu.vector_store %arg5[%c0_78, %c768_79], %126 {strides = array<i32>} : memref<8x900xf32, #tpu.memory_space<vmem>>, vector<8x128xf32>,
    %c0_80 = arith.constant 0 : index
    %c896 = arith.constant 896 : index
    %128 = vector.load %arg3[%c0_80, %c896] : memref<32x900xf32, #tpu.memory_space<vmem>>, vector<32x4xf32>
    %cst_81 = arith.constant dense<0.000000e+00> : vector<8x4xf32>
    %129 = tpu.matmul %0, %128, %cst_81 {dimension_numbers = #tpu.dot_dimension_numbers<[1], [0], [0], [1], [0, 0, 1, 1], [], []>, precision = #tpu.contract_precision<fp32>} : vector<8x32xf32>, vector<32x4xf32>, vector<8x4xf32> -> vector<8x4xf32>
    %c0_82 = arith.constant 0 : index
    %c896_83 = arith.constant 896 : index
    %130 = vector.load %arg4[%c0_82, %c896_83] : memref<32x900xf32, #tpu.memory_space<vmem>>, vector<32x4xf32>
    %cst_84 = arith.constant dense<0.000000e+00> : vector<8x4xf32>
    %131 = tpu.matmul %1, %130, %cst_84 {dimension_numbers = #tpu.dot_dimension_numbers<[1], [0], [0], [1], [0, 0, 1, 1], [], []>, precision = #tpu.contract_precision<fp32>} : vector<8x32xf32>, vector<32x4xf32>, vector<8x4xf32> -> vector<8x4xf32>
    %132 = arith.mulf %129, %131 : vector<8x4xf32>
    %cst_85 = arith.constant 5.000000e-01 : f32
    %133 = vector.broadcast %cst_85 : f32 to vector<8x4xf32>
    %134 = arith.mulf %133, %132 : vector<8x4xf32>
    %135 = arith.mulf %132, %132 : vector<8x4xf32>
    %cst_86 = arith.constant 0.0356774069 : f32
    %136 = vector.broadcast %cst_86 : f32 to vector<8x4xf32>
    %137 = arith.mulf %136, %135 : vector<8x4xf32>
    %cst_87 = arith.constant 0.797884583 : f32
    %138 = vector.broadcast %cst_87 : f32 to vector<8x4xf32>
    %139 = arith.addf %138, %137 : vector<8x4xf32>
    %140 = arith.mulf %132, %139 : vector<8x4xf32>
    %141 = math.tanh %140 : vector<8x4xf32>
    %cst_88 = arith.constant 1.000000e+00 : f32
    %142 = vector.broadcast %cst_88 : f32 to vector<8x4xf32>
    %143 = arith.addf %142, %141 : vector<8x4xf32>
    %144 = arith.mulf %134, %143 : vector<8x4xf32>
    %c0_89 = arith.constant 0 : index
    %c896_90 = arith.constant 896 : index
    %145 = vector.load %arg5[%c0_89, %c896_90] : memref<8x900xf32, #tpu.memory_space<vmem>>, vector<8x4xf32>
    tpu.vector_store %arg5[%c0_89, %c896_90], %144 {strides = array<i32>} : memref<8x900xf32, #tpu.memory_space<vmem>>, vector<8x4xf32>,
    return
  }
  func.func @transform_0(%arg0: i32) -> (i32, i32) {
    %c0_i32 = arith.constant 0 : i32
    %c0_i32_0 = arith.constant 0 : i32
    return %arg0, %c0_i32 : i32, i32
  }
  func.func @transform_1(%arg0: i32) -> (i32, i32) {
    %c0_i32 = arith.constant 0 : i32
    %c0_i32_0 = arith.constant 0 : i32
    return %arg0, %c0_i32 : i32, i32
  }
  func.func @transform_2(%arg0: i32) -> (i32, i32) {
    %c0_i32 = arith.constant 0 : i32
    %c0_i32_0 = arith.constant 0 : i32
    %c0_i32_1 = arith.constant 0 : i32
    return %c0_i32, %c0_i32_0 : i32, i32
  }
  func.func @transform_3(%arg0: i32) -> (i32, i32) {
    %c0_i32 = arith.constant 0 : i32
    %c0_i32_0 = arith.constant 0 : i32
    %c0_i32_1 = arith.constant 0 : i32
    return %c0_i32, %c0_i32_0 : i32, i32
  }
  func.func @transform_4(%arg0: i32) -> (i32, i32) {
    %c0_i32 = arith.constant 0 : i32
    %c0_i32_0 = arith.constant 0 : i32
    return %arg0, %c0_i32 : i32, i32
  }
}

</mosaic_0001>

<bundles_post_ra>
// kernel: tpu_custom_call.1
= control target key start
LH: loop header
LB: loop body
LE: loop exit
PB: predicated region body
PF: predicated region fallthrough
CT: control target
= control target key end

     0   :  { %9 = vsyncpa [#allocation3], 0  ;;  %s11761_s0 = inlined_call_operand.hbm [shape: f32[8,32], index: 0, kind: input, shape index: {}]   ;;  %s11762_s1 = inlined_call_operand.hbm [shape: f32[8,32], index: 1, kind: input, shape index: {}]   ;;  %s11763_s2 = inlined_call_operand.hbm [shape: f32[32,900], index: 2, kind: input, shape index: {}]   ;;  %s11764_s3 = inlined_call_operand.hbm [shape: f32[32,900], index: 3, kind: input, shape index: {}]   ;;  %s11765_s4 = inlined_call_operand.hbm [shape: f32[8,900], index: 4, kind: output, shape index: {}]  }
   0x1   :  { %10 = vsyncpa [#allocation6], 0 }
   0x2   :  { %11 = vsyncpa [#allocation9], 0 }
   0x3   :  { %12 = vsyncpa [#allocation4], 0  ;;  %s10416_s15 = smov [#allocation5]   ;;  %s10417_s17 = smov [#allocation2]  }
   0x4   :  { %s29_s16 = sshll.u32 %s10416_s15, 4  ;;  %s19_s18 = sshll.u32 %s10417_s17, 4  ;;  %s30_s16 = int_to_ptr.vmem [resolvable:$true] %s29_s16  ;;  %s20_s18 = int_to_ptr.vmem [resolvable:$true] %s19_s18 }
   0x5   :  { %s10298_s21 = scalar_lea.hbm %s11762_s1, 128 }
   0x6   :  { %p10299_p0 = scmp.ne.s32.totalorder %s11762_s1, %s10298_s21  ;;  %p10302_p1 = scmp.lt.u32.totalorder %s10298_s21, %s11762_s1 }
   0x8   :  { %p10304_p2 = pnand %p10302_p1, %p10299_p0 }
   0xa   :  { %10307 = shalt.err (!%p10304_p2)
}
   0xb   :  { %s10308_s26 = scalar_lea.vmem %s30_s16, 128  ;;  %p10313_p4 = scmp.lt.s32.totalorder %s30_s16, %s30_s16 }
   0xc   :  { %p10309_p3 = scmp.ne.s32.totalorder %s30_s16, %s10308_s26  ;;  %p10314_p5 = scmp.lt.s32.totalorder %s10308_s26, %s10308_s26 }
   0xe   :  { %p10315_p6 = por %p10314_p5, %p10313_p4 }
  0x10   :  { %p10316_p7 = pnand %p10315_p6, %p10309_p3 }
  0x12   :  { %10319 = shalt.err (!%p10316_p7)
}
  0x13   :  { %32 = dma.hbm_to_vmem [thread:$0]  %s11762_s1, 128, %s30_s16, [#allocation6]  }
  0x14   :  { %s10320_s5 = scalar_lea.hbm %s11761_s0, 128 }
  0x15   :  { %p10321_p8 = scmp.ne.s32.totalorder %s11761_s0, %s10320_s5  ;;  %p10324_p9 = scmp.lt.u32.totalorder %s10320_s5, %s11761_s0 }
  0x17   :  { %p10326_p10 = pnand %p10324_p9, %p10321_p8 }
  0x19   :  { %10329 = shalt.err (!%p10326_p10)
}
  0x1a   :  { %s10330_s10 = scalar_lea.vmem %s20_s18, 128  ;;  %p10335_p12 = scmp.lt.s32.totalorder %s20_s18, %s20_s18 }
  0x1b   :  { %p10331_p11 = scmp.ne.s32.totalorder %s20_s18, %s10330_s10  ;;  %p10336_p13 = scmp.lt.s32.totalorder %s10330_s10, %s10330_s10 }
  0x1d   :  { %p10337_p0 = por %p10336_p13, %p10335_p12 }
  0x1f   :  { %p10338_p1 = pnand %p10337_p0, %p10331_p11 }
  0x21   :  { %10341 = shalt.err (!%p10338_p1)
}
  0x22   :  { %22 = dma.hbm_to_vmem [thread:$0]  %s11761_s0, 128, %s20_s18, [#allocation3]  }
  0x23   :  { %s10418_s12 = smov [#allocation7]   ;;  %s10342_s16 = scalar_lea.hbm %s11763_s2, 4096 }
  0x24   :  { %s38_s13 = sshll.u32 %s10418_s12, 4  ;;  %p10343_p2 = scmp.ne.s32.totalorder %s11763_s2, %s10342_s16  ;;  %s39_s13 = int_to_ptr.vmem [resolvable:$true] %s38_s13 }
  0x25   :  { %p10346_p3 = scmp.lt.u32.totalorder %s10342_s16, %s11763_s2 }
  0x27   :  { %p10348_p4 = pnand %p10346_p3, %p10343_p2 }
  0x29   :  { %10351 = shalt.err (!%p10348_p4)
}
  0x2a   :  { %s10352_s22 = scalar_lea.vmem %s39_s13, 4096  ;;  %p10357_p6 = scmp.lt.s32.totalorder %s39_s13, %s39_s13 }
  0x2b   :  { %p10353_p5 = scmp.ne.s32.totalorder %s39_s13, %s10352_s22  ;;  %p10358_p7 = scmp.lt.s32.totalorder %s10352_s22, %s10352_s22 }
  0x2d   :  { %p10359_p8 = por %p10358_p7, %p10357_p6 }
  0x2f   :  { %p10360_p9 = pnand %p10359_p8, %p10353_p5 }
  0x31   :  { %10363 = shalt.err (!%p10360_p9)
}
  0x32   :  { %s10419_s0 = smov 1024   ;;  %s10420_s18 = smov 64  }
  0x33   :  { %44 = dma.hbm_to_vmem [thread:$0]  %s11763_s2, 4096, %s39_s13, [#allocation6], %s10419_s0, %s10419_s0, %s10420_s18  }
  0x34   :  { %s10421_s25 = smov [#allocation8]   ;;  %s10364_s29 = scalar_lea.hbm %s11764_s3, 4096 }
  0x35   :  { %s50_s26 = sshll.u32 %s10421_s25, 4  ;;  %p10365_p10 = scmp.ne.s32.totalorder %s11764_s3, %s10364_s29  ;;  %s51_s26 = int_to_ptr.vmem [resolvable:$true] %s50_s26 }
  0x36   :  { %p10368_p11 = scmp.lt.u32.totalorder %s10364_s29, %s11764_s3 }
  0x38   :  { %p10370_p12 = pnand %p10368_p11, %p10365_p10 }
  0x3a   :  { %10373 = shalt.err (!%p10370_p12)
}
  0x3b   :  { %s10374_s8 = scalar_lea.vmem %s51_s26, 4096  ;;  %p10379_p0 = scmp.lt.s32.totalorder %s51_s26, %s51_s26 }
  0x3c   :  { %p10375_p13 = scmp.ne.s32.totalorder %s51_s26, %s10374_s8  ;;  %p10380_p1 = scmp.lt.s32.totalorder %s10374_s8, %s10374_s8 }
  0x3e   :  { %p10381_p2 = por %p10380_p1, %p10379_p0 }
  0x40   :  { %p10382_p3 = pnand %p10381_p2, %p10375_p13 }
  0x42   :  { %10385 = shalt.err (!%p10382_p3)
}
  0x43   :  { %56 = dma.hbm_to_vmem [thread:$0]  %s11764_s3, 4096, %s51_s26, [#allocation9], %s10419_s0, %s10419_s0, %s10420_s18  }
  0x44   :  { %10408 = dma.done.wait [#allocation3], 128  }
  0x45   :  { %10409 = vsyncadd [#allocation3], 4294967168 }
  0x46   :  { %10410 = dma.done.wait [#allocation6], 4224  }
  0x47   :  { %10411 = vsyncadd [#allocation6], 4294963072 }
  0x48   :  { %10412 = dma.done.wait [#allocation9], 4096  }
  0x49   :  { %10413 = vsyncadd [#allocation9], 4294963200  ;;  %v10422_v0 = vmov 0.0|0.0   ;;  %vm10423_vm0 = vmmov 0   ;;  %v10424_v1 = vmov 0.0   ;;  %v71_v2 = vld [vmem:[#allocation7] sm:$0xff] }
  0x4a   :  { %9536 = vmatprep.subr.bf16.mxu0 %v10422_v0  ;;  %9572 = vmatprep.subr.bf16.mxu1 %v10422_v0  ;;  %v72_v3 = vld [vmem:[#allocation7 + $0x40] sm:$0xff]  ;;  %vm75_vm1 = vcmask 261120   ;;  %v80_v5 = vand.u32 4294901760, %v71_v2  ;;  %v69_v16 = vld [vmem:[#allocation2] sm:$0xff]  ;;  %v70_v21 = vld [vmem:[#allocation5] sm:$0xff]  ;;  %s10425_s3 = smov [#allocation10]  }
  0x4b   :  { %8488 = vmatprep.mubr.msk.f32.mxu0 %vm10423_vm0, %v10424_v1  ;;  %8554 = vmatprep.mubr.msk.f32.mxu1 %vm10423_vm0, %v10424_v1  ;;  %v564_v4 = vld [vmem:[#allocation8] sm:$0xff]  ;;  %v83_v6 = vand.u32 4294901760, %v72_v3  ;;  %v77_v29 = vsel %vm75_vm1, %v69_v16, 0  ;;  %v569_v31 = vsel %vm75_vm1, %v70_v21, 0  ;;  %v1066_v16 = vld [vmem:[#allocation7 + $0x8] sm:$0xff]  ;;  %s7989_s10 = sshll.u32 %s10425_s3, 4  ;;  %s7990_s10 = int_to_ptr.vmem [resolvable:$true] %s7989_s10 }
  0x4c   :  { %v565_v7 = vld [vmem:[#allocation8 + $0x40] sm:$0xff]  ;;  %v572_v8 = vand.u32 4294901760, %v564_v4  ;;  %v10507_v18 = vsub.f32 %v71_v2, %v80_v5  ;;  %v10527_v30 = vand.u32 4294901760, %v77_v29  ;;  %v10539_v37 = vand.u32 4294901760, %v569_v31  ;;  %v1067_v21 = vld [vmem:[#allocation7 + $0x48] sm:$0xff]  ;;  %s10386_s1 = scalar_lea.vmem %s7990_s10, 1024  ;;  %p10391_p5 = scmp.lt.s32.totalorder %s7990_s10, %s7990_s10 }
  0x4d   :  { %v73_v9 = vld [vmem:[#allocation7 + $0x80] sm:$0xff]  ;;  %v575_v11 = vand.u32 4294901760, %v565_v7  ;;  %v10505_v17 = vpack.c.bf16 %v83_v6, %v80_v5  ;;  %v10509_v19 = vsub.f32 %v72_v3, %v83_v6  ;;  %vm7981_vm2 = vcmask 31744   ;;  %p10387_p4 = scmp.ne.s32.totalorder %s7990_s10, %s10386_s1  ;;  %p10392_p6 = scmp.lt.s32.totalorder %s10386_s1, %s10386_s1 }
  0x4e   :  { %v74_v10 = vld [vmem:[#allocation7 + $0xc0] sm:$0xff]  ;;  %v86_v12 = vand.u32 4294901760, %v73_v9  ;;  %v10511_v20 = vsub.f32 %v564_v4, %v572_v8  ;;  %v161_v32 = vand.u32 4294901760, %v10507_v18  ;;  %v10542_v38 = vsub.f32 %v77_v29, %v10527_v30 }
  0x4f   :  { %v89_v13 = vand.u32 4294901760, %v74_v10  ;;  %v566_v14 = vld [vmem:[#allocation8 + $0x80] sm:$0xff]  ;;  %v10513_v22 = vpack.c.bf16 %v575_v11, %v572_v8  ;;  %v10515_v23 = vsub.f32 %v565_v7, %v575_v11  ;;  %9538 = vmatpush3.bf16.msra.mxu0 %v10505_v17  ;;  %v168_v33 = vand.u32 4294901760, %v10509_v19  ;;  %p10393_p7 = por %p10392_p6, %p10391_p5 }
  0x50   :  { %v567_v15 = vld [vmem:[#allocation8 + $0xc0] sm:$0xff]  ;;  %v10519_v25 = vsub.f32 %v73_v9, %v86_v12  ;;  %v578_v27 = vand.u32 4294901760, %v566_v14  ;;  %9539 = vmatprep.subr.bf16.mxu0 %v10422_v0  ;;  %v162_v39 = vsub.f32 %v10507_v18, %v161_v32  ;;  %v653_v41 = vand.u32 4294901760, %v10511_v20 }
  0x51   :  { %v10517_v24 = vpack.c.bf16 %v89_v13, %v86_v12  ;;  %v10522_v26 = vsub.f32 %v74_v10, %v89_v13  ;;  %v581_v28 = vand.u32 4294901760, %v567_v15  ;;  %9574 = vmatpush3.bf16.msra.mxu1 %v10513_v22  ;;  %v169_v40 = vsub.f32 %v10509_v19, %v168_v33  ;;  %p10394_p8 = pnand %p10393_p7, %p10387_p4 }
  0x52   :  { %9575 = vmatprep.subr.bf16.mxu1 %v10422_v0  ;;  %v10535_v35 = vsub.f32 %v566_v14, %v578_v27  ;;  %v10553_v42 = vsub.f32 %v569_v31, %v10539_v37  ;;  %v660_v43 = vand.u32 4294901760, %v10515_v23  ;;  %v175_v44 = vand.u32 4294901760, %v10519_v25 }
  0x53   :  { %v10533_v34 = vpack.c.bf16 %v581_v28, %v578_v27  ;;  %v10537_v36 = vsub.f32 %v567_v15, %v581_v28  ;;  %9541 = vmatpush3.bf16.msra.mxu0 %v10517_v24  ;;  %v182_v45 = vand.u32 4294901760, %v10522_v26  ;;  %v10560_v46 = vand.u32 4294901760, %v10542_v38  ;;  %v1555_v27 = vld [vmem:[#allocation8 + $0x8] sm:$0xff] }
  0x54   :  { %9542 = vmatprep.subr.bf16.mxu0 %v10422_v0  ;;  %v163_v47 = vand.u32 4294901760, %v162_v39  ;;  %v170_v48 = vand.u32 4294901760, %v169_v40  ;;  %v654_v49 = vsub.f32 %v10511_v20, %v653_v41  ;;  %v10567_v50 = vand.u32 4294901760, %v10553_v42  ;;  %v1556_v28 = vld [vmem:[#allocation8 + $0x48] sm:$0xff] }
  0x55   :  { %9577 = vmatpush3.bf16.msra.mxu1 %v10533_v34  ;;  %v661_v51 = vsub.f32 %v10515_v23, %v660_v43  ;;  %v176_v52 = vsub.f32 %v10519_v25, %v175_v44  ;;  %v183_v53 = vsub.f32 %v10522_v26, %v182_v45  ;;  %v151_v54 = vsub.f32 %v10542_v38, %v10560_v46 }
  0x56   :  { %9578 = vmatprep.subr.bf16.mxu1 %v10422_v0  ;;  %v9543_v55 = vpack.c.bf16 %v170_v48, %v163_v47  ;;  %v655_v56 = vand.u32 4294901760, %v654_v49  ;;  %v667_v57 = vand.u32 4294901760, %v10535_v35  ;;  %v643_v58 = vsub.f32 %v10553_v42, %v10567_v50 }
  0x57   :  { %v662_v59 = vand.u32 4294901760, %v661_v51  ;;  %v177_v60 = vand.u32 4294901760, %v176_v52  ;;  %v184_v61 = vand.u32 4294901760, %v183_v53  ;;  %v10584_v62 = vand.u32 4294901760, %v151_v54 }
  0x58   :  { %v668_v63 = vsub.f32 %v10535_v35, %v667_v57  ;;  %v674_v2 = vand.u32 4294901760, %v10537_v36  ;;  %v10590_v3 = vand.u32 4294901760, %v643_v58  ;;  %v9549_v10 = vpack.c.bf16 %v10509_v19, %v10507_v18 }
  0x59   :  { %v9579_v4 = vpack.c.bf16 %v662_v59, %v655_v56  ;;  %8489 = vmatmul.mubr.f32.vlgmr.msra.gmra.mrb[0].mxu0 %v10584_v62  ;;  %v9546_v7 = vpack.c.bf16 %v184_v61, %v177_v60  ;;  %v9585_v11 = vpack.c.bf16 %v10515_v23, %v10511_v20  ;;  %v9552_v12 = vpack.c.bf16 %v10522_v26, %v10519_v25  ;;  %v1557_v25 = vld [vmem:[#allocation8 + $0x88] sm:$0xff] }
  0x5a   :  { %v669_v5 = vand.u32 4294901760, %v668_v63  ;;  %v675_v6 = vsub.f32 %v10537_v36, %v674_v2  ;;  %8555 = vmatmul.mubr.f32.vlgmr.msra.gmra.mrb[0].mxu1 %v10590_v3  ;;  %9544 = vmatpush3.bf16.msra.mxu0 %v9543_v55  ;;  %v9588_v13 = vpack.c.bf16 %v10537_v36, %v10535_v35  ;;  %v9561_v14 = vpack.c.bf16 %v168_v33, %v161_v32  ;;  %v1068_v32 = vld [vmem:[#allocation7 + $0x88] sm:$0xff] }
  0x5b   :  { %9580 = vmatpush3.bf16.msra.mxu1 %v9579_v4  ;;  %9545 = vmatprep.subr.bf16.mxu0 %v10422_v0  ;;  %v9597_v15 = vpack.c.bf16 %v660_v43, %v653_v41  ;;  %v9564_v18 = vpack.c.bf16 %v182_v45, %v175_v44  ;;  %v1071_v19 = vand.u32 4294901760, %v1066_v16  ;;  %v1074_v20 = vand.u32 4294901760, %v1067_v21  ;;  %v1069_v33 = vld [vmem:[#allocation7 + $0xc8] sm:$0xff] }
  0x5c   :  { %v676_v8 = vand.u32 4294901760, %v675_v6  ;;  %9581 = vmatprep.subr.bf16.mxu1 %v10422_v0  ;;  %8499 = vmatprep.mubr.msk.f32.mxu0 %vm10423_vm0, %v10424_v1  ;;  %v9600_v23 = vpack.c.bf16 %v674_v2, %v667_v57  ;;  %v1560_v29 = vand.u32 4294901760, %v1555_v27  ;;  %v1563_v31 = vand.u32 4294901760, %v1556_v28  ;;  %v1558_v26 = vld [vmem:[#allocation8 + $0xc8] sm:$0xff] }
  0x5d   :  { %8565 = vmatprep.mubr.msk.f32.mxu1 %vm10423_vm0, %v10424_v1  ;;  %v10657_v36 = vsub.f32 %v1066_v16, %v1071_v19  ;;  %v10659_v39 = vsub.f32 %v1067_v21, %v1074_v20  ;;  %v1077_v35 = vand.u32 4294901760, %v1068_v32  ;;  %v1080_v40 = vand.u32 4294901760, %v1069_v33 }
  0x5e   :  { %v9582_v9 = vpack.c.bf16 %v676_v8, %v669_v5  ;;  %9547 = vmatpush3.bf16.msra.mxu0 %v9546_v7  ;;  %v10662_v41 = vsub.f32 %v1555_v27, %v1560_v29  ;;  %v10664_v43 = vsub.f32 %v1556_v28, %v1563_v31  ;;  %v1566_v44 = vand.u32 4294901760, %v1557_v25 }
  0x5f   :  { %9548 = vmatprep.subr.bf16.mxu0 %v10422_v0  ;;  %v1569_v45 = vand.u32 4294901760, %v1558_v26  ;;  %v10670_v47 = vsub.f32 %v1068_v32, %v1077_v35  ;;  %v10672_v48 = vsub.f32 %v1069_v33, %v1080_v40  ;;  %v1152_v49 = vand.u32 4294901760, %v10657_v36  ;;  %v2054_v32 = vld [vmem:[#allocation7 + $0x10] sm:$0xff] }
  0x60   :  { %9583 = vmatpush3.bf16.msra.mxu1 %v9582_v9  ;;  %v1159_v51 = vand.u32 4294901760, %v10659_v39  ;;  %v10678_v52 = vsub.f32 %v1557_v25, %v1566_v44  ;;  %v1641_v54 = vand.u32 4294901760, %v10662_v41  ;;  %v10689_v55 = vpack.c.bf16 %v1074_v20, %v1071_v19  ;;  %v2055_v33 = vld [vmem:[#allocation7 + $0x50] sm:$0xff] }
  0x61   :  { %9584 = vmatprep.subr.bf16.mxu1 %v10422_v0  ;;  %8500 = vmatmul.mubr.f32.vlgmr.msra.gmra.mrb[0].mxu0 %v10527_v30  ;;  %v10680_v53 = vsub.f32 %v1558_v26, %v1569_v45  ;;  %v1153_v56 = vsub.f32 %v10657_v36, %v1152_v49  ;;  %v1166_v58 = vand.u32 4294901760, %v10670_v47  ;;  %v1173_v59 = vand.u32 4294901760, %v10672_v48  ;;  %v2543_v25 = vld [vmem:[#allocation8 + $0x10] sm:$0xff] }
  0x62   :  { %9550 = vmatpush3.bf16.msra.mxu0 %v9549_v10  ;;  %8510 = vmatprep.mubr.msk.f32.mxu0 %vm10423_vm0, %v10424_v1  ;;  %v1160_v57 = vsub.f32 %v10659_v39, %v1159_v51  ;;  %v1655_v61 = vand.u32 4294901760, %v10678_v52  ;;  %v10714_v2 = vpack.c.bf16 %v1080_v40, %v1077_v35  ;;  %v9657_v19 = vpack.c.bf16 %v10664_v43, %v10662_v41  ;;  %v2544_v26 = vld [vmem:[#allocation8 + $0x50] sm:$0xff] }
  0x63   :  { %8566 = vmatmul.mubr.f32.vlgmr.msra.gmra.mrb[0].mxu1 %v10539_v37  ;;  %9551 = vmatprep.subr.bf16.mxu0 %v10422_v0  ;;  %v1662_v63 = vand.u32 4294901760, %v10680_v53  ;;  %v1154_v4 = vand.u32 4294901760, %v1153_v56  ;;  %v1167_v6 = vsub.f32 %v10670_v47, %v1166_v58  ;;  %v1174_v7 = vsub.f32 %v10672_v48, %v1173_v59 }
  0x64   :  { %9586 = vmatpush3.bf16.msra.mxu1 %v9585_v11  ;;  %8576 = vmatprep.mubr.msk.f32.mxu1 %vm10423_vm0, %v10424_v1  ;;  %v1161_v5 = vand.u32 4294901760, %v1160_v57  ;;  %v1656_v10 = vsub.f32 %v10678_v52, %v1655_v61  ;;  %v9624_v20 = vpack.c.bf16 %v10672_v48, %v10670_v47  ;;  %v2062_v35 = vand.u32 4294901760, %v2055_v33  ;;  %v2545_v47 = vld [vmem:[#allocation8 + $0x90] sm:$0xff] }
  0x65   :  { %9587 = vmatprep.subr.bf16.mxu1 %v10422_v0  ;;  %v1663_v11 = vsub.f32 %v10680_v53, %v1662_v63  ;;  %v9672_v40 = vpack.c.bf16 %v1662_v63, %v1655_v61  ;;  %v2546_v48 = vld [vmem:[#allocation8 + $0xd0] sm:$0xff]  ;;  %v2554_v56 = vand.u32 4294901760, %v2545_v47 }
  0x66   :  { %9553 = vmatpush3.bf16.msra.mxu0 %v9552_v12  ;;  %v9615_v12 = vpack.c.bf16 %v1161_v5, %v1154_v4  ;;  %v1657_v16 = vand.u32 4294901760, %v1656_v10  ;;  %v2557_v57 = vand.u32 4294901760, %v2546_v48 }
  0x67   :  { %9554 = vmatprep.subr.bf16.mxu0 %v10422_v0  ;;  %v1664_v21 = vand.u32 4294901760, %v1663_v11  ;;  %v10830_v61 = vsub.f32 %v2545_v47, %v2554_v56  ;;  %v3531_v47 = vld [vmem:[#allocation8 + $0x18] sm:$0xff] }
  0x68   :  { %9589 = vmatpush3.bf16.msra.mxu1 %v9588_v13  ;;  %v1168_v13 = vand.u32 4294901760, %v1167_v6  ;;  %v10832_v63 = vsub.f32 %v2546_v48, %v2557_v57  ;;  %v3532_v48 = vld [vmem:[#allocation8 + $0x58] sm:$0xff] }
  0x69   :  { %9590 = vmatprep.subr.bf16.mxu1 %v10422_v0  ;;  %8511 = vmatmul.mubr.f32.vlgmr.msra.gmra.mrb[0].mxu0 %v10542_v38  ;;  %v9654_v28 = vpack.c.bf16 %v1664_v21, %v1657_v16  ;;  %v2643_v11 = vand.u32 4294901760, %v10830_v61 }
  0x6a   :  { %9556 = vmatpush3.bf16.msra.mxu0 %v10505_v17  ;;  %8521 = vmatprep.mubr.msk.f32.mxu0 %vm10423_vm0, %v10424_v1 }
  0x6b   :  { %8577 = vmatmul.mubr.f32.vlgmr.msra.gmra.mrb[0].mxu1 %v10553_v42  ;;  %9557 = vmatprep.subr.bf16.mxu0 %v10422_v0 }
  0x6c   :  { %9592 = vmatpush3.bf16.msra.mxu1 %v10513_v22  ;;  %8587 = vmatprep.mubr.msk.f32.mxu1 %vm10423_vm0, %v10424_v1 }
  0x6d   :  { %9593 = vmatprep.subr.bf16.mxu1 %v10422_v0 }
  0x6e   :  { %9559 = vmatpush3.bf16.msra.mxu0 %v10517_v24 }
  0x6f   :  { %9560 = vmatprep.subr.bf16.mxu0 %v10422_v0 }
  0x70   :  { %9595 = vmatpush3.bf16.msra.mxu1 %v10533_v34 }
  0x71   :  { %9596 = vmatprep.subr.bf16.mxu1 %v10422_v0  ;;  %8522 = vmatmul.mubr.f32.vlgmr.msra.gmra.mrb[0].mxu0 %v10560_v46 }
  0x72   :  { %9562 = vmatpush3.bf16.msra.mxu0 %v9561_v14  ;;  %8532 = vmatprep.mubr.msk.f32.mxu0 %vm10423_vm0, %v10424_v1  ;;  %v1175_v14 = vand.u32 4294901760, %v1174_v7 }
  0x73   :  { %8588 = vmatmul.mubr.f32.vlgmr.msra.gmra.mrb[0].mxu1 %v10567_v50  ;;  %9563 = vmatprep.subr.bf16.mxu0 %v10422_v0 }
  0x74   :  { %9598 = vmatpush3.bf16.msra.mxu1 %v9597_v15  ;;  %8598 = vmatprep.mubr.msk.f32.mxu1 %vm10423_vm0, %v10424_v1  ;;  %v9618_v27 = vpack.c.bf16 %v1175_v14, %v1168_v13 }
  0x75   :  { %9599 = vmatprep.subr.bf16.mxu1 %v10422_v0 }
  0x76   :  { %9565 = vmatpush3.bf16.msra.mxu0 %v9564_v18  ;;  %v9621_v18 = vpack.c.bf16 %v10659_v39, %v10657_v36  ;;  %v9636_v36 = vpack.c.bf16 %v1173_v59, %v1166_v58  ;;  %v2059_v39 = vand.u32 4294901760, %v2054_v32 }
  0x77   :  { %9566 = vmatprep.subr.bf16.mxu0 %v10422_v0 }
  0x78   :  { %9601 = vmatpush3.bf16.msra.mxu1 %v9600_v23  ;;  %v9660_v23 = vpack.c.bf16 %v10680_v53, %v10678_v52  ;;  %v10841_v5 = vpack.c.bf16 %v2062_v35, %v2059_v39 }
  0x79   :  { %9602 = vmatprep.subr.bf16.mxu1 %v10422_v0  ;;  %8533 = vmatmul.mubr.f32.vlgmr.msra.gmra.mrb[0].mxu0 %v10527_v30 }
  0x7a   :  { %9568 = vmatpush3.bf16.msra.mxu0 %v10505_v17  ;;  %v1648_v17 = vand.u32 4294901760, %v10664_v43  ;;  %8543 = vmatprep.mubr.msk.f32.mxu0 %vm10423_vm0, %v10424_v1 }
  0x7b   :  { %8599 = vmatmul.mubr.f32.vlgmr.msra.gmra.mrb[0].mxu1 %v10539_v37  ;;  %9569 = vmatprep.subr.bf16.mxu0 %v10422_v0 }
  0x7c   :  { %9604 = vmatpush3.bf16.msra.mxu1 %v10513_v22  ;;  %8609 = vmatprep.mubr.msk.f32.mxu1 %vm10423_vm0, %v10424_v1  ;;  %v10691_v22 = vpack.c.bf16 %v1563_v31, %v1560_v29  ;;  %v1649_v60 = vsub.f32 %v10664_v43, %v1648_v17  ;;  %v9633_v29 = vpack.c.bf16 %v1159_v51, %v1152_v49  ;;  %v2551_v43 = vand.u32 4294901760, %v2544_v26 }
  0x7d   :  { %9605 = vmatprep.subr.bf16.mxu1 %v10422_v0  ;;  %v9669_v31 = vpack.c.bf16 %v1648_v17, %v1641_v54  ;;  %v10809_v49 = vsub.f32 %v2054_v32, %v2059_v39  ;;  %v10811_v51 = vsub.f32 %v2055_v33, %v2062_v35 }
  0x7e   :  { %9571 = vmatpush3.bf16.msra.mxu0 %v10517_v24  ;;  %v1642_v24 = vsub.f32 %v10662_v41, %v1641_v54  ;;  %v1650_v9 = vand.u32 4294901760, %v1649_v60  ;;  %v2548_v41 = vand.u32 4294901760, %v2543_v25  ;;  %v10816_v17 = vsub.f32 %v2544_v26, %v2551_v43 }
  0x7f   :  { %9608 = vmatprep.subr.bf16.mxu0 %v10422_v0  ;;  %v2147_v60 = vand.u32 4294901760, %v10811_v51 }
  0x80   :  { %9607 = vmatpush3.bf16.msra.mxu1 %v10533_v34  ;;  %v10716_v34 = vpack.c.bf16 %v1569_v45, %v1566_v44  ;;  %v1643_v8 = vand.u32 4294901760, %v1642_v24  ;;  %v2056_v44 = vld [vmem:[#allocation7 + $0x90] sm:$0xff]  ;;  %v10814_v54 = vsub.f32 %v2543_v25, %v2548_v41  ;;  %v2140_v24 = vand.u32 4294901760, %v10809_v49 }
  0x81   :  { %9644 = vmatprep.subr.bf16.mxu1 %v10422_v0  ;;  %8544 = vmatmul.mubr.f32.vlgmr.msra.gmra.mrb[0].mxu0 %v10527_v30  ;;  %v2057_v45 = vld [vmem:[#allocation7 + $0xd0] sm:$0xff]  ;;  %v2065_v52 = vand.u32 4294901760, %v2056_v44  ;;  %v2148_v7 = vsub.f32 %v10811_v51, %v2147_v60 }
  0x82   :  { %9610 = vmatpush3.bf16.msra.mxu0 %v10689_v55  ;;  %8620 = vmatprep.mubr.msk.f32.mxu0 %vm10423_vm0, %v10424_v1  ;;  %v9651_v15 = vpack.c.bf16 %v1650_v9, %v1643_v8  ;;  %v2068_v53 = vand.u32 4294901760, %v2057_v45  ;;  %v2629_v4 = vand.u32 4294901760, %v10814_v54  ;;  %v2141_v6 = vsub.f32 %v10809_v49, %v2140_v24 }
  0x83   :  { %8610 = vmatmul.mubr.f32.vlgmr.msra.gmra.mrb[0].mxu1 %v10539_v37  ;;  %9611 = vmatprep.subr.bf16.mxu0 %v10422_v0  ;;  %v10822_v58 = vsub.f32 %v2056_v44, %v2065_v52  ;;  %v9729_v39 = vpack.c.bf16 %v10816_v17, %v10814_v54  ;;  %v3042_v44 = vld [vmem:[#allocation7 + $0x18] sm:$0xff] }
  0x84   :  { %9646 = vmatpush3.bf16.msra.mxu1 %v10691_v22  ;;  %8686 = vmatprep.mubr.msk.f32.mxu1 %vm10423_vm0, %v10424_v1  ;;  %v10824_v59 = vsub.f32 %v2057_v45, %v2068_v53  ;;  %v10866_v13 = vpack.c.bf16 %v2068_v53, %v2065_v52  ;;  %v2142_v14 = vand.u32 4294901760, %v2141_v6  ;;  %v3043_v45 = vld [vmem:[#allocation7 + $0x58] sm:$0xff] }
  0x85   :  { %9647 = vmatprep.subr.bf16.mxu1 %v10422_v0  ;;  %v2154_v8 = vand.u32 4294901760, %v10822_v58  ;;  %v3050_v52 = vand.u32 4294901760, %v3043_v45 }
  0x86   :  { %9613 = vmatpush3.bf16.msra.mxu0 %v10714_v2  ;;  %v2161_v9 = vand.u32 4294901760, %v10824_v59  ;;  %v9696_v35 = vpack.c.bf16 %v10824_v59, %v10822_v58 }
  0x87   :  { %9614 = vmatprep.subr.bf16.mxu0 %v10422_v0  ;;  %v2155_v16 = vsub.f32 %v10822_v58, %v2154_v8  ;;  %v3533_v58 = vld [vmem:[#allocation8 + $0x98] sm:$0xff] }
  0x88   :  { %9649 = vmatpush3.bf16.msra.mxu1 %v10716_v34  ;;  %v2162_v21 = vsub.f32 %v10824_v59, %v2161_v9  ;;  %v3534_v59 = vld [vmem:[#allocation8 + $0xd8] sm:$0xff]  ;;  %v3542_v6 = vand.u32 4294901760, %v3533_v58 }
  0x89   :  { %9650 = vmatprep.subr.bf16.mxu1 %v10422_v0  ;;  %8621 = vmatmul.mubr.f32.vlgmr.msra.gmra.mrb[2].mxu0 %v10584_v62 }
  0x8a   :  { %9616 = vmatpush3.bf16.msra.mxu0 %v9615_v12  ;;  %8631 = vmatprep.mubr.msk.f32.mxu0 %vm10423_vm0, %v10424_v1  ;;  %v2650_v12 = vand.u32 4294901760, %v10832_v63 }
  0x8b   :  { %8687 = vmatmul.mubr.f32.vlgmr.msra.gmra.mrb[2].mxu1 %v10590_v3  ;;  %9617 = vmatprep.subr.bf16.mxu0 %v10422_v0 }
  0x8c   :  { %9652 = vmatpush3.bf16.msra.mxu1 %v9651_v15  ;;  %8697 = vmatprep.mubr.msk.f32.mxu1 %vm10423_vm0, %v10424_v1  ;;  %v2149_v15 = vand.u32 4294901760, %v2148_v7  ;;  %v9744_v53 = vpack.c.bf16 %v2650_v12, %v2643_v11  ;;  %v3545_v7 = vand.u32 4294901760, %v3534_v59 }
  0x8d   :  { %9653 = vmatprep.subr.bf16.mxu1 %v10422_v0 }
  0x8e   :  { %9619 = vmatpush3.bf16.msra.mxu0 %v9618_v27 }
  0x8f   :  { %9620 = vmatprep.subr.bf16.mxu0 %v10422_v0 }
  0x90   :  { %9655 = vmatpush3.bf16.msra.mxu1 %v9654_v28 }
  0x91   :  { %9656 = vmatprep.subr.bf16.mxu1 %v10422_v0  ;;  %8632 = vmatmul.mubr.f32.vlgmr.msra.gmra.mrb[2].mxu0 %v10527_v30 }
  0x92   :  { %9622 = vmatpush3.bf16.msra.mxu0 %v9621_v18  ;;  %8642 = vmatprep.mubr.msk.f32.mxu0 %vm10423_vm0, %v10424_v1  ;;  %v2644_v18 = vsub.f32 %v10830_v61, %v2643_v11  ;;  %v10982_v11 = vsub.f32 %v3533_v58, %v3542_v6  ;;  %v4519_v58 = vld [vmem:[#allocation8 + $0x20] sm:$0xff] }
  0x93   :  { %8698 = vmatmul.mubr.f32.vlgmr.msra.gmra.mrb[2].mxu1 %v10539_v37  ;;  %9623 = vmatprep.subr.bf16.mxu0 %v10422_v0 }
  0x94   :  { %9658 = vmatpush3.bf16.msra.mxu1 %v9657_v19  ;;  %8708 = vmatprep.mubr.msk.f32.mxu1 %vm10423_vm0, %v10424_v1  ;;  %v2651_v19 = vsub.f32 %v10832_v63, %v2650_v12  ;;  %v2645_v32 = vand.u32 4294901760, %v2644_v18  ;;  %v10984_v12 = vsub.f32 %v3534_v59, %v3545_v7  ;;  %v4520_v59 = vld [vmem:[#allocation8 + $0x60] sm:$0xff] }
  0x95   :  { %9659 = vmatprep.subr.bf16.mxu1 %v10422_v0 }
  0x96   :  { %9625 = vmatpush3.bf16.msra.mxu0 %v9624_v20  ;;  %v9687_v20 = vpack.c.bf16 %v2149_v15, %v2142_v14  ;;  %v2652_v33 = vand.u32 4294901760, %v2651_v19  ;;  %v3631_v19 = vand.u32 4294901760, %v10982_v11 }
  0x97   :  { %9626 = vmatprep.subr.bf16.mxu0 %v10422_v0 }
  0x98   :  { %9661 = vmatpush3.bf16.msra.mxu1 %v9660_v23  ;;  %v2156_v23 = vand.u32 4294901760, %v2155_v16  ;;  %v9726_v26 = vpack.c.bf16 %v2652_v33, %v2645_v32 }
  0x99   :  { %9662 = vmatprep.subr.bf16.mxu1 %v10422_v0  ;;  %8643 = vmatmul.mubr.f32.vlgmr.msra.gmra.mrb[2].mxu0 %v10542_v38 }
  0x9a   :  { %9628 = vmatpush3.bf16.msra.mxu0 %v10689_v55  ;;  %8653 = vmatprep.mubr.msk.f32.mxu0 %vm10423_vm0, %v10424_v1 }
  0x9b   :  { %8709 = vmatmul.mubr.f32.vlgmr.msra.gmra.mrb[2].mxu1 %v10553_v42  ;;  %9629 = vmatprep.subr.bf16.mxu0 %v10422_v0 }
  0x9c   :  { %9664 = vmatpush3.bf16.msra.mxu1 %v10691_v22  ;;  %8719 = vmatprep.mubr.msk.f32.mxu1 %vm10423_vm0, %v10424_v1 }
  0x9d   :  { %9665 = vmatprep.subr.bf16.mxu1 %v10422_v0 }
  0x9e   :  { %9631 = vmatpush3.bf16.msra.mxu0 %v10714_v2 }
  0x9f   :  { %9632 = vmatprep.subr.bf16.mxu0 %v10422_v0 }
  0xa0   :  { %9667 = vmatpush3.bf16.msra.mxu1 %v10716_v34 }
  0xa1   :  { %9668 = vmatprep.subr.bf16.mxu1 %v10422_v0  ;;  %8654 = vmatmul.mubr.f32.vlgmr.msra.gmra.mrb[2].mxu0 %v10560_v46 }
  0xa2   :  { %9634 = vmatpush3.bf16.msra.mxu0 %v9633_v29  ;;  %8664 = vmatprep.mubr.msk.f32.mxu0 %vm10423_vm0, %v10424_v1  ;;  %v2163_v29 = vand.u32 4294901760, %v2162_v21 }
  0xa3   :  { %8720 = vmatmul.mubr.f32.vlgmr.msra.gmra.mrb[2].mxu1 %v10567_v50  ;;  %9635 = vmatprep.subr.bf16.mxu0 %v10422_v0 }
  0xa4   :  { %9670 = vmatpush3.bf16.msra.mxu1 %v9669_v31  ;;  %8730 = vmatprep.mubr.msk.f32.mxu1 %vm10423_vm0, %v10424_v1  ;;  %v9690_v25 = vpack.c.bf16 %v2163_v29, %v2156_v23 }
  0xa5   :  { %9671 = vmatprep.subr.bf16.mxu1 %v10422_v0 }
  0xa6   :  { %9637 = vmatpush3.bf16.msra.mxu0 %v9636_v36  ;;  %v9693_v36 = vpack.c.bf16 %v10811_v51, %v10809_v49  ;;  %v9708_v49 = vpack.c.bf16 %v2161_v9, %v2154_v8  ;;  %v3047_v51 = vand.u32 4294901760, %v3042_v44 }
  0xa7   :  { %9638 = vmatprep.subr.bf16.mxu0 %v10422_v0 }
  0xa8   :  { %9673 = vmatpush3.bf16.msra.mxu1 %v9672_v40  ;;  %v9732_v40 = vpack.c.bf16 %v10832_v63, %v10830_v61  ;;  %v10993_v15 = vpack.c.bf16 %v3050_v52, %v3047_v51 }
  0xa9   :  { %9674 = vmatprep.subr.bf16.mxu1 %v10422_v0  ;;  %8665 = vmatmul.mubr.f32.vlgmr.msra.gmra.mrb[2].mxu0 %v10527_v30 }
  0xaa   :  { %9640 = vmatpush3.bf16.msra.mxu0 %v10689_v55  ;;  %v2636_v55 = vand.u32 4294901760, %v10816_v17  ;;  %8675 = vmatprep.mubr.msk.f32.mxu0 %vm10423_vm0, %v10424_v1 }
  0xab   :  { %8731 = vmatmul.mubr.f32.vlgmr.msra.gmra.mrb[2].mxu1 %v10539_v37  ;;  %9641 = vmatprep.subr.bf16.mxu0 %v10422_v0 }
  0xac   :  { %9676 = vmatpush3.bf16.msra.mxu1 %v10691_v22  ;;  %8741 = vmatprep.mubr.msk.f32.mxu1 %vm10423_vm0, %v10424_v1  ;;  %v10843_v22 = vpack.c.bf16 %v2551_v43, %v2548_v41  ;;  %v2637_v10 = vsub.f32 %v10816_v17, %v2636_v55  ;;  %v9705_v41 = vpack.c.bf16 %v2147_v60, %v2140_v24  ;;  %v3539_v17 = vand.u32 4294901760, %v3532_v48 }
  0xad   :  { %9677 = vmatprep.subr.bf16.mxu1 %v10422_v0  ;;  %v9741_v43 = vpack.c.bf16 %v2636_v55, %v2629_v4  ;;  %v10961_v24 = vsub.f32 %v3042_v44, %v3047_v51  ;;  %v10963_v60 = vsub.f32 %v3043_v45, %v3050_v52 }
  0xae   :  { %9643 = vmatpush3.bf16.msra.mxu0 %v10714_v2  ;;  %v2630_v2 = vsub.f32 %v10814_v54, %v2629_v4  ;;  %v2638_v28 = vand.u32 4294901760, %v2637_v10  ;;  %v3536_v54 = vand.u32 4294901760, %v3531_v47  ;;  %v10968_v55 = vsub.f32 %v3532_v48, %v3539_v17 }
  0xaf   :  { %9680 = vmatprep.subr.bf16.mxu0 %v10422_v0  ;;  %v3135_v10 = vand.u32 4294901760, %v10963_v60 }
  0xb0   :  { %9679 = vmatpush3.bf16.msra.mxu1 %v10716_v34  ;;  %v10868_v34 = vpack.c.bf16 %v2557_v57, %v2554_v56  ;;  %v2631_v27 = vand.u32 4294901760, %v2630_v2  ;;  %v3044_v56 = vld [vmem:[#allocation7 + $0x98] sm:$0xff]  ;;  %v10966_v4 = vsub.f32 %v3531_v47, %v3536_v54  ;;  %v3128_v2 = vand.u32 4294901760, %v10961_v24 }
  0xb1   :  { %9716 = vmatprep.subr.bf16.mxu1 %v10422_v0  ;;  %8676 = vmatmul.mubr.f32.vlgmr.msra.gmra.mrb[2].mxu0 %v10527_v30  ;;  %v3045_v57 = vld [vmem:[#allocation7 + $0xd8] sm:$0xff]  ;;  %v3053_v61 = vand.u32 4294901760, %v3044_v56  ;;  %v3136_v21 = vsub.f32 %v10963_v60, %v3135_v10 }
  0xb2   :  { %9682 = vmatpush3.bf16.msra.mxu0 %v10841_v5  ;;  %8752 = vmatprep.mubr.msk.f32.mxu0 %vm10423_vm0, %v10424_v1  ;;  %v9723_v31 = vpack.c.bf16 %v2638_v28, %v2631_v27  ;;  %v3056_v63 = vand.u32 4294901760, %v3045_v57  ;;  %v3617_v14 = vand.u32 4294901760, %v10966_v4  ;;  %v3129_v16 = vsub.f32 %v10961_v24, %v3128_v2 }
  0xb3   :  { %8742 = vmatmul.mubr.f32.vlgmr.msra.gmra.mrb[2].mxu1 %v10539_v37  ;;  %9683 = vmatprep.subr.bf16.mxu0 %v10422_v0  ;;  %v10974_v8 = vsub.f32 %v3044_v56, %v3053_v61  ;;  %v9801_v51 = vpack.c.bf16 %v10968_v55, %v10966_v4  ;;  %v4030_v56 = vld [vmem:[#allocation7 + $0x20] sm:$0xff] }
  0xb4   :  { %9718 = vmatpush3.bf16.msra.mxu1 %v10843_v22  ;;  %8818 = vmatprep.mubr.msk.f32.mxu1 %vm10423_vm0, %v10424_v1  ;;  %v10976_v9 = vsub.f32 %v3045_v57, %v3056_v63  ;;  %v11018_v23 = vpack.c.bf16 %v3056_v63, %v3053_v61  ;;  %v3130_v29 = vand.u32 4294901760, %v3129_v16  ;;  %v4031_v57 = vld [vmem:[#allocation7 + $0x60] sm:$0xff] }
  0xb5   :  { %9719 = vmatprep.subr.bf16.mxu1 %v10422_v0  ;;  %v3142_v27 = vand.u32 4294901760, %v10974_v8  ;;  %v4038_v61 = vand.u32 4294901760, %v4031_v57 }
  0xb6   :  { %9685 = vmatpush3.bf16.msra.mxu0 %v10866_v13  ;;  %v3149_v28 = vand.u32 4294901760, %v10976_v9  ;;  %v9768_v52 = vpack.c.bf16 %v10976_v9, %v10974_v8 }
  0xb7   :  { %9686 = vmatprep.subr.bf16.mxu0 %v10422_v0  ;;  %v3143_v32 = vsub.f32 %v10974_v8, %v3142_v27  ;;  %v4521_v8 = vld [vmem:[#allocation8 + $0xa0] sm:$0xff] }
  0xb8   :  { %9721 = vmatpush3.bf16.msra.mxu1 %v10868_v34  ;;  %v3150_v33 = vsub.f32 %v10976_v9, %v3149_v28  ;;  %v4522_v9 = vld [vmem:[#allocation8 + $0xe0] sm:$0xff]  ;;  %v4530_v16 = vand.u32 4294901760, %v4521_v8 }
  0xb9   :  { %9722 = vmatprep.subr.bf16.mxu1 %v10422_v0  ;;  %8753 = vmatmul.mubr.f32.vlgmr.msra.gmra.mrb[4].mxu0 %v10584_v62 }
  0xba   :  { %9688 = vmatpush3.bf16.msra.mxu0 %v9687_v20  ;;  %8763 = vmatprep.mubr.msk.f32.mxu0 %vm10423_vm0, %v10424_v1  ;;  %v3638_v20 = vand.u32 4294901760, %v10984_v12 }
  0xbb   :  { %8819 = vmatmul.mubr.f32.vlgmr.msra.gmra.mrb[4].mxu1 %v10590_v3  ;;  %9689 = vmatprep.subr.bf16.mxu0 %v10422_v0 }
  0xbc   :  { %9724 = vmatpush3.bf16.msra.mxu1 %v9723_v31  ;;  %8829 = vmatprep.mubr.msk.f32.mxu1 %vm10423_vm0, %v10424_v1  ;;  %v3137_v31 = vand.u32 4294901760, %v3136_v21  ;;  %v9816_v63 = vpack.c.bf16 %v3638_v20, %v3631_v19  ;;  %v4533_v21 = vand.u32 4294901760, %v4522_v9 }
  0xbd   :  { %9725 = vmatprep.subr.bf16.mxu1 %v10422_v0 }
  0xbe   :  { %9691 = vmatpush3.bf16.msra.mxu0 %v9690_v25 }
  0xbf   :  { %9692 = vmatprep.subr.bf16.mxu0 %v10422_v0 }
  0xc0   :  { %9727 = vmatpush3.bf16.msra.mxu1 %v9726_v26 }
  0xc1   :  { %9728 = vmatprep.subr.bf16.mxu1 %v10422_v0  ;;  %8764 = vmatmul.mubr.f32.vlgmr.msra.gmra.mrb[4].mxu0 %v10527_v30 }
  0xc2   :  { %9694 = vmatpush3.bf16.msra.mxu0 %v9693_v36  ;;  %8774 = vmatprep.mubr.msk.f32.mxu0 %vm10423_vm0, %v10424_v1  ;;  %v3632_v36 = vsub.f32 %v10982_v11, %v3631_v19  ;;  %v11134_v19 = vsub.f32 %v4521_v8, %v4530_v16  ;;  %v5507_v8 = vld [vmem:[#allocation8 + $0x28] sm:$0xff] }
  0xc3   :  { %8830 = vmatmul.mubr.f32.vlgmr.msra.gmra.mrb[4].mxu1 %v10539_v37  ;;  %9695 = vmatprep.subr.bf16.mxu0 %v10422_v0 }
  0xc4   :  { %9730 = vmatpush3.bf16.msra.mxu1 %v9729_v39  ;;  %8840 = vmatprep.mubr.msk.f32.mxu1 %vm10423_vm0, %v10424_v1  ;;  %v3639_v39 = vsub.f32 %v10984_v12, %v3638_v20  ;;  %v3633_v44 = vand.u32 4294901760, %v3632_v36  ;;  %v11136_v20 = vsub.f32 %v4522_v9, %v4533_v21  ;;  %v5508_v9 = vld [vmem:[#allocation8 + $0x68] sm:$0xff] }
  0xc5   :  { %9731 = vmatprep.subr.bf16.mxu1 %v10422_v0 }
  0xc6   :  { %9697 = vmatpush3.bf16.msra.mxu0 %v9696_v35  ;;  %v9759_v35 = vpack.c.bf16 %v3137_v31, %v3130_v29  ;;  %v3640_v45 = vand.u32 4294901760, %v3639_v39  ;;  %v4619_v39 = vand.u32 4294901760, %v11134_v19 }
  0xc7   :  { %9698 = vmatprep.subr.bf16.mxu0 %v10422_v0 }
  0xc8   :  { %9733 = vmatpush3.bf16.msra.mxu1 %v9732_v40  ;;  %v3144_v40 = vand.u32 4294901760, %v3143_v32  ;;  %v9798_v48 = vpack.c.bf16 %v3640_v45, %v3633_v44 }
  0xc9   :  { %9734 = vmatprep.subr.bf16.mxu1 %v10422_v0  ;;  %8775 = vmatmul.mubr.f32.vlgmr.msra.gmra.mrb[4].mxu0 %v10542_v38 }
  0xca   :  { %9700 = vmatpush3.bf16.msra.mxu0 %v10841_v5  ;;  %8785 = vmatprep.mubr.msk.f32.mxu0 %vm10423_vm0, %v10424_v1 }
  0xcb   :  { %8841 = vmatmul.mubr.f32.vlgmr.msra.gmra.mrb[4].mxu1 %v10553_v42  ;;  %9701 = vmatprep.subr.bf16.mxu0 %v10422_v0 }
  0xcc   :  { %9736 = vmatpush3.bf16.msra.mxu1 %v10843_v22  ;;  %8851 = vmatprep.mubr.msk.f32.mxu1 %vm10423_vm0, %v10424_v1 }
  0xcd   :  { %9737 = vmatprep.subr.bf16.mxu1 %v10422_v0 }
  0xce   :  { %9703 = vmatpush3.bf16.msra.mxu0 %v10866_v13 }
  0xcf   :  { %9704 = vmatprep.subr.bf16.mxu0 %v10422_v0 }
  0xd0   :  { %9739 = vmatpush3.bf16.msra.mxu1 %v10868_v34 }
  0xd1   :  { %9740 = vmatprep.subr.bf16.mxu1 %v10422_v0  ;;  %8786 = vmatmul.mubr.f32.vlgmr.msra.gmra.mrb[4].mxu0 %v10560_v46 }
  0xd2   :  { %9706 = vmatpush3.bf16.msra.mxu0 %v9705_v41  ;;  %8796 = vmatprep.mubr.msk.f32.mxu0 %vm10423_vm0, %v10424_v1  ;;  %v3151_v41 = vand.u32 4294901760, %v3150_v33 }
  0xd3   :  { %8852 = vmatmul.mubr.f32.vlgmr.msra.gmra.mrb[4].mxu1 %v10567_v50  ;;  %9707 = vmatprep.subr.bf16.mxu0 %v10422_v0 }
  0xd4   :  { %9742 = vmatpush3.bf16.msra.mxu1 %v9741_v43  ;;  %8862 = vmatprep.mubr.msk.f32.mxu1 %vm10423_vm0, %v10424_v1  ;;  %v9762_v47 = vpack.c.bf16 %v3151_v41, %v3144_v40 }
  0xd5   :  { %9743 = vmatprep.subr.bf16.mxu1 %v10422_v0 }
  0xd6   :  { %9709 = vmatpush3.bf16.msra.mxu0 %v9708_v49  ;;  %v9765_v49 = vpack.c.bf16 %v10963_v60, %v10961_v24  ;;  %v9780_v24 = vpack.c.bf16 %v3149_v28, %v3142_v27  ;;  %v4035_v60 = vand.u32 4294901760, %v4030_v56 }
  0xd7   :  { %9710 = vmatprep.subr.bf16.mxu0 %v10422_v0 }
  0xd8   :  { %9745 = vmatpush3.bf16.msra.mxu1 %v9744_v53  ;;  %v9804_v53 = vpack.c.bf16 %v10984_v12, %v10982_v11  ;;  %v11145_v31 = vpack.c.bf16 %v4038_v61, %v4035_v60 }
  0xd9   :  { %9746 = vmatprep.subr.bf16.mxu1 %v10422_v0  ;;  %8797 = vmatmul.mubr.f32.vlgmr.msra.gmra.mrb[4].mxu0 %v10527_v30 }
  0xda   :  { %9712 = vmatpush3.bf16.msra.mxu0 %v10841_v5  ;;  %v3624_v5 = vand.u32 4294901760, %v10968_v55  ;;  %8807 = vmatprep.mubr.msk.f32.mxu0 %vm10423_vm0, %v10424_v1 }
  0xdb   :  { %8863 = vmatmul.mubr.f32.vlgmr.msra.gmra.mrb[4].mxu1 %v10539_v37  ;;  %9713 = vmatprep.subr.bf16.mxu0 %v10422_v0 }
  0xdc   :  { %9748 = vmatpush3.bf16.msra.mxu1 %v10843_v22  ;;  %8873 = vmatprep.mubr.msk.f32.mxu1 %vm10423_vm0, %v10424_v1  ;;  %v10995_v22 = vpack.c.bf16 %v3539_v17, %v3536_v54  ;;  %v3625_v18 = vsub.f32 %v10968_v55, %v3624_v5  ;;  %v9777_v54 = vpack.c.bf16 %v3135_v10, %v3128_v2  ;;  %v4527_v55 = vand.u32 4294901760, %v4520_v59 }
  0xdd   :  { %9749 = vmatprep.subr.bf16.mxu1 %v10422_v0  ;;  %v9813_v17 = vpack.c.bf16 %v3624_v5, %v3617_v14  ;;  %v11113_v2 = vsub.f32 %v4030_v56, %v4035_v60  ;;  %v11115_v10 = vsub.f32 %v4031_v57, %v4038_v61 }
  0xde   :  { %9715 = vmatpush3.bf16.msra.mxu0 %v10866_v13  ;;  %v3618_v13 = vsub.f32 %v10966_v4, %v3617_v14  ;;  %v3626_v26 = vand.u32 4294901760, %v3625_v18  ;;  %v4524_v4 = vand.u32 4294901760, %v4519_v58  ;;  %v11120_v5 = vsub.f32 %v4520_v59, %v4527_v55 }
  0xdf   :  { %9752 = vmatprep.subr.bf16.mxu0 %v10422_v0  ;;  %v4123_v18 = vand.u32 4294901760, %v11115_v10 }
  0xe0   :  { %9751 = vmatpush3.bf16.msra.mxu1 %v10868_v34  ;;  %v11020_v34 = vpack.c.bf16 %v3545_v7, %v3542_v6  ;;  %v3619_v25 = vand.u32 4294901760, %v3618_v13  ;;  %v4032_v6 = vld [vmem:[#allocation7 + $0xa0] sm:$0xff]  ;;  %v11118_v14 = vsub.f32 %v4519_v58, %v4524_v4  ;;  %v4116_v13 = vand.u32 4294901760, %v11113_v2 }
  0xe1   :  { %9788 = vmatprep.subr.bf16.mxu1 %v10422_v0  ;;  %8808 = vmatmul.mubr.f32.vlgmr.msra.gmra.mrb[4].mxu0 %v10527_v30  ;;  %v4033_v7 = vld [vmem:[#allocation7 + $0xe0] sm:$0xff]  ;;  %v4041_v11 = vand.u32 4294901760, %v4032_v6  ;;  %v4124_v33 = vsub.f32 %v11115_v10, %v4123_v18 }
  0xe2   :  { %9754 = vmatpush3.bf16.msra.mxu0 %v10993_v15  ;;  %8884 = vmatprep.mubr.msk.f32.mxu0 %vm10423_vm0, %v10424_v1  ;;  %v9795_v43 = vpack.c.bf16 %v3626_v26, %v3619_v25  ;;  %v4044_v12 = vand.u32 4294901760, %v4033_v7  ;;  %v4605_v29 = vand.u32 4294901760, %v11118_v14  ;;  %v4117_v32 = vsub.f32 %v11113_v2, %v4116_v13 }
  0xe3   :  { %8874 = vmatmul.mubr.f32.vlgmr.msra.gmra.mrb[4].mxu1 %v10539_v37  ;;  %9755 = vmatprep.subr.bf16.mxu0 %v10422_v0  ;;  %v11126_v27 = vsub.f32 %v4032_v6, %v4041_v11  ;;  %v9873_v60 = vpack.c.bf16 %v11120_v5, %v11118_v14  ;;  %v5018_v6 = vld [vmem:[#allocation7 + $0x28] sm:$0xff] }
  0xe4   :  { %9790 = vmatpush3.bf16.msra.mxu1 %v10995_v22  ;;  %8950 = vmatprep.mubr.msk.f32.mxu1 %vm10423_vm0, %v10424_v1  ;;  %v11128_v28 = vsub.f32 %v4033_v7, %v4044_v12  ;;  %v11170_v40 = vpack.c.bf16 %v4044_v12, %v4041_v11  ;;  %v4118_v41 = vand.u32 4294901760, %v4117_v32  ;;  %v5019_v7 = vld [vmem:[#allocation7 + $0x68] sm:$0xff] }
  0xe5   :  { %9791 = vmatprep.subr.bf16.mxu1 %v10422_v0  ;;  %v4130_v25 = vand.u32 4294901760, %v11126_v27  ;;  %v5026_v11 = vand.u32 4294901760, %v5019_v7 }
  0xe6   :  { %9757 = vmatpush3.bf16.msra.mxu0 %v11018_v23  ;;  %v4137_v26 = vand.u32 4294901760, %v11128_v28  ;;  %v9840_v61 = vpack.c.bf16 %v11128_v28, %v11126_v27 }
  0xe7   :  { %9758 = vmatprep.subr.bf16.mxu0 %v10422_v0  ;;  %v4131_v44 = vsub.f32 %v11126_v27, %v4130_v25  ;;  %v5509_v27 = vld [vmem:[#allocation8 + $0xa8] sm:$0xff] }
  0xe8   :  { %9793 = vmatpush3.bf16.msra.mxu1 %v11020_v34  ;;  %v4138_v45 = vsub.f32 %v11128_v28, %v4137_v26  ;;  %v5510_v28 = vld [vmem:[#allocation8 + $0xe8] sm:$0xff]  ;;  %v5518_v32 = vand.u32 4294901760, %v5509_v27 }
  0xe9   :  { %9794 = vmatprep.subr.bf16.mxu1 %v10422_v0  ;;  %8885 = vmatmul.mubr.f32.vlgmr.msra.gmra.mrb[6].mxu0 %v10584_v62 }
  0xea   :  { %9760 = vmatpush3.bf16.msra.mxu0 %v9759_v35  ;;  %8895 = vmatprep.mubr.msk.f32.mxu0 %vm10423_vm0, %v10424_v1  ;;  %v4626_v35 = vand.u32 4294901760, %v11136_v20 }
  0xeb   :  { %8951 = vmatmul.mubr.f32.vlgmr.msra.gmra.mrb[6].mxu1 %v10590_v3  ;;  %9761 = vmatprep.subr.bf16.mxu0 %v10422_v0 }
  0xec   :  { %9796 = vmatpush3.bf16.msra.mxu1 %v9795_v43  ;;  %8961 = vmatprep.mubr.msk.f32.mxu1 %vm10423_vm0, %v10424_v1  ;;  %v4125_v43 = vand.u32 4294901760, %v4124_v33  ;;  %v9888_v12 = vpack.c.bf16 %v4626_v35, %v4619_v39  ;;  %v5521_v33 = vand.u32 4294901760, %v5510_v28 }
  0xed   :  { %9797 = vmatprep.subr.bf16.mxu1 %v10422_v0 }
  0xee   :  { %9763 = vmatpush3.bf16.msra.mxu0 %v9762_v47 }
  0xef   :  { %9764 = vmatprep.subr.bf16.mxu0 %v10422_v0 }
  0xf0   :  { %9799 = vmatpush3.bf16.msra.mxu1 %v9798_v48 }
  0xf1   :  { %9800 = vmatprep.subr.bf16.mxu1 %v10422_v0  ;;  %8896 = vmatmul.mubr.f32.vlgmr.msra.gmra.mrb[6].mxu0 %v10527_v30 }
  0xf2   :  { %9766 = vmatpush3.bf16.msra.mxu0 %v9765_v49  ;;  %8906 = vmatprep.mubr.msk.f32.mxu0 %vm10423_vm0, %v10424_v1  ;;  %v4620_v49 = vsub.f32 %v11134_v19, %v4619_v39  ;;  %v11286_v39 = vsub.f32 %v5509_v27, %v5518_v32 }
  0xf3   :  { %8962 = vmatmul.mubr.f32.vlgmr.msra.gmra.mrb[6].mxu1 %v10539_v37  ;;  %9767 = vmatprep.subr.bf16.mxu0 %v10422_v0 }
  0xf4   :  { %9802 = vmatpush3.bf16.msra.mxu1 %v9801_v51  ;;  %8972 = vmatprep.mubr.msk.f32.mxu1 %vm10423_vm0, %v10424_v1  ;;  %v4627_v51 = vsub.f32 %v11136_v20, %v4626_v35  ;;  %v4621_v56 = vand.u32 4294901760, %v4620_v49  ;;  %v11288_v35 = vsub.f32 %v5510_v28, %v5521_v33 }
  0xf5   :  { %9803 = vmatprep.subr.bf16.mxu1 %v10422_v0 }
  0xf6   :  { %9769 = vmatpush3.bf16.msra.mxu0 %v9768_v52  ;;  %v9831_v52 = vpack.c.bf16 %v4125_v43, %v4118_v41  ;;  %v4628_v57 = vand.u32 4294901760, %v4627_v51  ;;  %v5607_v51 = vand.u32 4294901760, %v11286_v39 }
  0xf7   :  { %9770 = vmatprep.subr.bf16.mxu0 %v10422_v0 }
  0xf8   :  { %9805 = vmatpush3.bf16.msra.mxu1 %v9804_v53  ;;  %v4132_v53 = vand.u32 4294901760, %v4131_v44  ;;  %v9870_v59 = vpack.c.bf16 %v4628_v57, %v4621_v56 }
  0xf9   :  { %9806 = vmatprep.subr.bf16.mxu1 %v10422_v0  ;;  %8907 = vmatmul.mubr.f32.vlgmr.msra.gmra.mrb[6].mxu0 %v10542_v38 }
  0xfa   :  { %9772 = vmatpush3.bf16.msra.mxu0 %v10993_v15  ;;  %8917 = vmatprep.mubr.msk.f32.mxu0 %vm10423_vm0, %v10424_v1 }
  0xfb   :  { %8973 = vmatmul.mubr.f32.vlgmr.msra.gmra.mrb[6].mxu1 %v10553_v42  ;;  %9773 = vmatprep.subr.bf16.mxu0 %v10422_v0 }
  0xfc   :  { %9808 = vmatpush3.bf16.msra.mxu1 %v10995_v22  ;;  %8983 = vmatprep.mubr.msk.f32.mxu1 %vm10423_vm0, %v10424_v1 }
  0xfd   :  { %9809 = vmatprep.subr.bf16.mxu1 %v10422_v0 }
  0xfe   :  { %9775 = vmatpush3.bf16.msra.mxu0 %v11018_v23 }
  0xff   :  { %9776 = vmatprep.subr.bf16.mxu0 %v10422_v0 }
 0x100   :  { %9811 = vmatpush3.bf16.msra.mxu1 %v11020_v34 }
 0x101   :  { %9812 = vmatprep.subr.bf16.mxu1 %v10422_v0  ;;  %8918 = vmatmul.mubr.f32.vlgmr.msra.gmra.mrb[6].mxu0 %v10560_v46 }
 0x102   :  { %9778 = vmatpush3.bf16.msra.mxu0 %v9777_v54  ;;  %8928 = vmatprep.mubr.msk.f32.mxu0 %vm10423_vm0, %v10424_v1  ;;  %v4139_v54 = vand.u32 4294901760, %v4138_v45 }
 0x103   :  { %8984 = vmatmul.mubr.f32.vlgmr.msra.gmra.mrb[6].mxu1 %v10567_v50  ;;  %9779 = vmatprep.subr.bf16.mxu0 %v10422_v0 }
 0x104   :  { %9814 = vmatpush3.bf16.msra.mxu1 %v9813_v17  ;;  %8994 = vmatprep.mubr.msk.f32.mxu1 %vm10423_vm0, %v10424_v1  ;;  %v9834_v58 = vpack.c.bf16 %v4139_v54, %v4132_v53 }
 0x105   :  { %9815 = vmatprep.subr.bf16.mxu1 %v10422_v0 }
 0x106   :  { %9781 = vmatpush3.bf16.msra.mxu0 %v9780_v24  ;;  %v9837_v24 = vpack.c.bf16 %v11115_v10, %v11113_v2  ;;  %v9852_v2 = vpack.c.bf16 %v4137_v26, %v4130_v25  ;;  %v5023_v10 = vand.u32 4294901760, %v5018_v6 }
 0x107   :  { %9782 = vmatprep.subr.bf16.mxu0 %v10422_v0 }
 0x108   :  { %9817 = vmatpush3.bf16.msra.mxu1 %v9816_v63  ;;  %v9876_v63 = vpack.c.bf16 %v11136_v20, %v11134_v19  ;;  %v11297_v43 = vpack.c.bf16 %v5026_v11, %v5023_v10 }
 0x109   :  { %9818 = vmatprep.subr.bf16.mxu1 %v10422_v0  ;;  %8929 = vmatmul.mubr.f32.vlgmr.msra.gmra.mrb[6].mxu0 %v10527_v30 }
 0x10a   :  { %9784 = vmatpush3.bf16.msra.mxu0 %v10993_v15  ;;  %v4612_v15 = vand.u32 4294901760, %v11120_v5  ;;  %8939 = vmatprep.mubr.msk.f32.mxu0 %vm10423_vm0, %v10424_v1 }
 0x10b   :  { %8995 = vmatmul.mubr.f32.vlgmr.msra.gmra.mrb[6].mxu1 %v10539_v37  ;;  %9785 = vmatprep.subr.bf16.mxu0 %v10422_v0 }
 0x10c   :  { %9820 = vmatpush3.bf16.msra.mxu1 %v10995_v22  ;;  %9005 = vmatprep.mubr.msk.f32.mxu1 %vm10423_vm0, %v10424_v1  ;;  %v11147_v22 = vpack.c.bf16 %v4527_v55, %v4524_v4  ;;  %v4613_v36 = vsub.f32 %v11120_v5, %v4612_v15  ;;  %v9849_v4 = vpack.c.bf16 %v4123_v18, %v4116_v13  ;;  %v5515_v5 = vand.u32 4294901760, %v5508_v9 }
 0x10d   :  { %9821 = vmatprep.subr.bf16.mxu1 %v10422_v0  ;;  %v9885_v55 = vpack.c.bf16 %v4612_v15, %v4605_v29  ;;  %v11265_v13 = vsub.f32 %v5018_v6, %v5023_v10  ;;  %v11267_v18 = vsub.f32 %v5019_v7, %v5026_v11 }
 0x10e   :  { %9787 = vmatpush3.bf16.msra.mxu0 %v11018_v23  ;;  %v4606_v23 = vsub.f32 %v11118_v14, %v4605_v29  ;;  %v4614_v48 = vand.u32 4294901760, %v4613_v36  ;;  %v5512_v14 = vand.u32 4294901760, %v5507_v8  ;;  %v11272_v15 = vsub.f32 %v5508_v9, %v5515_v5 }
 0x10f   :  { %9824 = vmatprep.subr.bf16.mxu0 %v10422_v0  ;;  %v5111_v36 = vand.u32 4294901760, %v11267_v18 }
 0x110   :  { %9823 = vmatpush3.bf16.msra.mxu1 %v11020_v34  ;;  %v11172_v34 = vpack.c.bf16 %v4533_v21, %v4530_v16  ;;  %v4607_v47 = vand.u32 4294901760, %v4606_v23  ;;  %v5020_v16 = vld [vmem:[#allocation7 + $0xa8] sm:$0xff]  ;;  %v11270_v29 = vsub.f32 %v5507_v8, %v5512_v14  ;;  %v5104_v23 = vand.u32 4294901760, %v11265_v13 }
 0x111   :  { %9860 = vmatprep.subr.bf16.mxu1 %v10422_v0  ;;  %8940 = vmatmul.mubr.f32.vlgmr.msra.gmra.mrb[6].mxu0 %v10527_v30  ;;  %v5021_v21 = vld [vmem:[#allocation7 + $0xe8] sm:$0xff]  ;;  %v5029_v19 = vand.u32 4294901760, %v5020_v16  ;;  %v5112_v45 = vsub.f32 %v11267_v18, %v5111_v36 }
 0x112   :  { %9826 = vmatpush3.bf16.msra.mxu0 %v11145_v31  ;;  %9016 = vmatprep.mubr.msk.f32.mxu0 %vm10423_vm0, %v10424_v1  ;;  %v9867_v17 = vpack.c.bf16 %v4614_v48, %v4607_v47  ;;  %v5032_v20 = vand.u32 4294901760, %v5021_v21  ;;  %v5593_v41 = vand.u32 4294901760, %v11270_v29  ;;  %v5105_v44 = vsub.f32 %v11265_v13, %v5104_v23 }
 0x113   :  { %9006 = vmatmul.mubr.f32.vlgmr.msra.gmra.mrb[6].mxu1 %v10539_v37  ;;  %9827 = vmatprep.subr.bf16.mxu0 %v10422_v0  ;;  %v11278_v25 = vsub.f32 %v5020_v16, %v5029_v19  ;;  %v9945_v10 = vpack.c.bf16 %v11272_v15, %v11270_v29 }
 0x114   :  { %9862 = vmatpush3.bf16.msra.mxu1 %v11147_v22  ;;  %9082 = vmatprep.mubr.msk.f32.mxu1 %vm10423_vm0, %v10424_v1  ;;  %v11280_v26 = vsub.f32 %v5021_v21, %v5032_v20  ;;  %v11322_v53 = vpack.c.bf16 %v5032_v20, %v5029_v19  ;;  %v5106_v54 = vand.u32 4294901760, %v5105_v44  ;;  %v6006_v44 = vld [vmem:[#allocation7 + $0x30] sm:$0xff] }
 0x115   :  { %9863 = vmatprep.subr.bf16.mxu1 %v10422_v0  ;;  %v5118_v47 = vand.u32 4294901760, %v11278_v25 }
 0x116   :  { %9829 = vmatpush3.bf16.msra.mxu0 %v11170_v40  ;;  %v5125_v48 = vand.u32 4294901760, %v11280_v26  ;;  %v9912_v11 = vpack.c.bf16 %v11280_v26, %v11278_v25 }
 0x117   :  { %9830 = vmatprep.subr.bf16.mxu0 %v10422_v0  ;;  %v5119_v56 = vsub.f32 %v11278_v25, %v5118_v47  ;;  %v6497_v25 = vld [vmem:[#allocation8 + $0xb0] sm:$0xff] }
 0x118   :  { %9865 = vmatpush3.bf16.msra.mxu1 %v11172_v34  ;;  %v5126_v57 = vsub.f32 %v11280_v26, %v5125_v48  ;;  %v6498_v26 = vld [vmem:[#allocation8 + $0xf0] sm:$0xff] }
 0x119   :  { %9866 = vmatprep.subr.bf16.mxu1 %v10422_v0  ;;  %9017 = vmatmul.mubr.f32.vlgmr.msra.gmra.mrb[8].mxu0 %v10584_v62 }
 0x11a   :  { %9832 = vmatpush3.bf16.msra.mxu0 %v9831_v52  ;;  %9027 = vmatprep.mubr.msk.f32.mxu0 %vm10423_vm0, %v10424_v1  ;;  %v5614_v52 = vand.u32 4294901760, %v11288_v35 }
 0x11b   :  { %9083 = vmatmul.mubr.f32.vlgmr.msra.gmra.mrb[8].mxu1 %v10590_v3  ;;  %9833 = vmatprep.subr.bf16.mxu0 %v10422_v0 }
 0x11c   :  { %9868 = vmatpush3.bf16.msra.mxu1 %v9867_v17  ;;  %9093 = vmatprep.mubr.msk.f32.mxu1 %vm10423_vm0, %v10424_v1  ;;  %v5113_v17 = vand.u32 4294901760, %v5112_v45  ;;  %v6007_v45 = vld [vmem:[#allocation7 + $0x70] sm:$0xff] }
 0x11d   :  { %9869 = vmatprep.subr.bf16.mxu1 %v10422_v0 }
 0x11e   :  { %9835 = vmatpush3.bf16.msra.mxu0 %v9834_v58 }
 0x11f   :  { %9836 = vmatprep.subr.bf16.mxu0 %v10422_v0 }
 0x120   :  { %9871 = vmatpush3.bf16.msra.mxu1 %v9870_v59 }
 0x121   :  { %9872 = vmatprep.subr.bf16.mxu1 %v10422_v0  ;;  %9028 = vmatmul.mubr.f32.vlgmr.msra.gmra.mrb[8].mxu0 %v10527_v30 }
 0x122   :  { %9838 = vmatpush3.bf16.msra.mxu0 %v9837_v24  ;;  %9038 = vmatprep.mubr.msk.f32.mxu0 %vm10423_vm0, %v10424_v1  ;;  %v5608_v24 = vsub.f32 %v11286_v39, %v5607_v51 }
 0x123   :  { %9094 = vmatmul.mubr.f32.vlgmr.msra.gmra.mrb[8].mxu1 %v10539_v37  ;;  %9839 = vmatprep.subr.bf16.mxu0 %v10422_v0 }
 0x124   :  { %9874 = vmatpush3.bf16.msra.mxu1 %v9873_v60  ;;  %9104 = vmatprep.mubr.msk.f32.mxu1 %vm10423_vm0, %v10424_v1  ;;  %v5615_v60 = vsub.f32 %v11288_v35, %v5614_v52  ;;  %v5609_v6 = vand.u32 4294901760, %v5608_v24 }
 0x125   :  { %9875 = vmatprep.subr.bf16.mxu1 %v10422_v0 }
 0x126   :  { %9841 = vmatpush3.bf16.msra.mxu0 %v9840_v61  ;;  %v9903_v61 = vpack.c.bf16 %v5113_v17, %v5106_v54  ;;  %v5616_v7 = vand.u32 4294901760, %v5615_v60  ;;  %v6496_v54 = vld [vmem:[#allocation8 + $0x70] sm:$0xff]  ;;  %v6506_v17 = vand.u32 4294901760, %v6497_v25 }
 0x127   :  { %9842 = vmatprep.subr.bf16.mxu0 %v10422_v0 }
 0x128   :  { %9877 = vmatpush3.bf16.msra.mxu1 %v9876_v63  ;;  %v5120_v63 = vand.u32 4294901760, %v5119_v56  ;;  %v9942_v9 = vpack.c.bf16 %v5616_v7, %v5609_v6  ;;  %v6509_v56 = vand.u32 4294901760, %v6498_v26  ;;  %v11446_v6 = vsub.f32 %v6497_v25, %v6506_v17 }
 0x129   :  { %9878 = vmatprep.subr.bf16.mxu1 %v10422_v0  ;;  %9039 = vmatmul.mubr.f32.vlgmr.msra.gmra.mrb[8].mxu0 %v10542_v38 }
 0x12a   :  { %9844 = vmatpush3.bf16.msra.mxu0 %v11145_v31  ;;  %9049 = vmatprep.mubr.msk.f32.mxu0 %vm10423_vm0, %v10424_v1  ;;  %v11448_v7 = vsub.f32 %v6498_v26, %v6509_v56 }
 0x12b   :  { %9105 = vmatmul.mubr.f32.vlgmr.msra.gmra.mrb[8].mxu1 %v10553_v42  ;;  %9845 = vmatprep.subr.bf16.mxu0 %v10422_v0 }
 0x12c   :  { %9880 = vmatpush3.bf16.msra.mxu1 %v11147_v22  ;;  %9115 = vmatprep.mubr.msk.f32.mxu1 %vm10423_vm0, %v10424_v1 }
 0x12d   :  { %9881 = vmatprep.subr.bf16.mxu1 %v10422_v0 }
 0x12e   :  { %9847 = vmatpush3.bf16.msra.mxu0 %v11170_v40 }
 0x12f   :  { %9848 = vmatprep.subr.bf16.mxu0 %v10422_v0 }
 0x130   :  { %9883 = vmatpush3.bf16.msra.mxu1 %v11172_v34 }
 0x131   :  { %9884 = vmatprep.subr.bf16.mxu1 %v10422_v0  ;;  %9050 = vmatmul.mubr.f32.vlgmr.msra.gmra.mrb[8].mxu0 %v10560_v46 }
 0x132   :  { %9850 = vmatpush3.bf16.msra.mxu0 %v9849_v4  ;;  %9060 = vmatprep.mubr.msk.f32.mxu0 %vm10423_vm0, %v10424_v1  ;;  %v5127_v4 = vand.u32 4294901760, %v5126_v57 }
 0x133   :  { %9116 = vmatmul.mubr.f32.vlgmr.msra.gmra.mrb[8].mxu1 %v10567_v50  ;;  %9851 = vmatprep.subr.bf16.mxu0 %v10422_v0 }
 0x134   :  { %9886 = vmatpush3.bf16.msra.mxu1 %v9885_v55  ;;  %9126 = vmatprep.mubr.msk.f32.mxu1 %vm10423_vm0, %v10424_v1  ;;  %v9906_v8 = vpack.c.bf16 %v5127_v4, %v5120_v63 }
 0x135   :  { %9887 = vmatprep.subr.bf16.mxu1 %v10422_v0 }
 0x136   :  { %9853 = vmatpush3.bf16.msra.mxu0 %v9852_v2  ;;  %v9909_v2 = vpack.c.bf16 %v11267_v18, %v11265_v13  ;;  %v6011_v13 = vand.u32 4294901760, %v6006_v44  ;;  %v6014_v18 = vand.u32 4294901760, %v6007_v45 }
 0x137   :  { %9854 = vmatprep.subr.bf16.mxu0 %v10422_v0 }
 0x138   :  { %9889 = vmatpush3.bf16.msra.mxu1 %v9888_v12  ;;  %v9948_v12 = vpack.c.bf16 %v11288_v35, %v11286_v39 }
 0x139   :  { %9890 = vmatprep.subr.bf16.mxu1 %v10422_v0  ;;  %9061 = vmatmul.mubr.f32.vlgmr.msra.gmra.mrb[8].mxu0 %v10527_v30 }
 0x13a   :  { %9856 = vmatpush3.bf16.msra.mxu0 %v11145_v31  ;;  %v5600_v31 = vand.u32 4294901760, %v11272_v15  ;;  %9071 = vmatprep.mubr.msk.f32.mxu0 %vm10423_vm0, %v10424_v1 }
 0x13b   :  { %9127 = vmatmul.mubr.f32.vlgmr.msra.gmra.mrb[8].mxu1 %v10539_v37  ;;  %9857 = vmatprep.subr.bf16.mxu0 %v10422_v0 }
 0x13c   :  { %9892 = vmatpush3.bf16.msra.mxu1 %v11147_v22  ;;  %9137 = vmatprep.mubr.msk.f32.mxu1 %vm10423_vm0, %v10424_v1  ;;  %v11299_v22 = vpack.c.bf16 %v5515_v5, %v5512_v14  ;;  %v5601_v49 = vsub.f32 %v11272_v15, %v5600_v31  ;;  %v6503_v15 = vand.u32 4294901760, %v6496_v54 }
 0x13d   :  { %9893 = vmatprep.subr.bf16.mxu1 %v10422_v0 }
 0x13e   :  { %9859 = vmatpush3.bf16.msra.mxu0 %v11170_v40  ;;  %v5594_v40 = vsub.f32 %v11270_v29, %v5593_v41  ;;  %v5602_v59 = vand.u32 4294901760, %v5601_v49  ;;  %v6495_v49 = vld [vmem:[#allocation8 + $0x30] sm:$0xff]  ;;  %v9924_v29 = vpack.c.bf16 %v5125_v48, %v5118_v47  ;;  %v11422_v47 = vsub.f32 %v6006_v44, %v6011_v13 }
 0x13f   :  { %9896 = vmatprep.subr.bf16.mxu0 %v10422_v0  ;;  %v11424_v48 = vsub.f32 %v6007_v45, %v6014_v18  ;;  %v11428_v35 = vsub.f32 %v6496_v54, %v6503_v15 }
 0x140   :  { %9895 = vmatpush3.bf16.msra.mxu1 %v11172_v34  ;;  %v11324_v34 = vpack.c.bf16 %v5521_v33, %v5518_v32  ;;  %v5595_v58 = vand.u32 4294901760, %v5594_v40  ;;  %v9921_v33 = vpack.c.bf16 %v5111_v36, %v5104_v23  ;;  %v9957_v40 = vpack.c.bf16 %v5600_v31, %v5593_v41  ;;  %v6008_v41 = vld [vmem:[#allocation7 + $0xb0] sm:$0xff] }
 0x141   :  { %9932 = vmatprep.subr.bf16.mxu1 %v10422_v0  ;;  %9072 = vmatmul.mubr.f32.vlgmr.msra.gmra.mrb[8].mxu0 %v10527_v30  ;;  %v6500_v23 = vand.u32 4294901760, %v6495_v49  ;;  %v9960_v36 = vpack.c.bf16 %v5614_v52, %v5607_v51  ;;  %v6009_v31 = vld [vmem:[#allocation7 + $0xf0] sm:$0xff]  ;;  %v6017_v51 = vand.u32 4294901760, %v6008_v41  ;;  %v6092_v57 = vand.u32 4294901760, %v11422_v47 }
 0x142   :  { %9898 = vmatpush3.bf16.msra.mxu0 %v11297_v43  ;;  %9148 = vmatprep.mubr.msk.f32.mxu0 %vm10423_vm0, %v10424_v1  ;;  %v9939_v55 = vpack.c.bf16 %v5602_v59, %v5595_v58  ;;  %v6020_v52 = vand.u32 4294901760, %v6009_v31  ;;  %v6099_v58 = vand.u32 4294901760, %v11424_v48  ;;  %v6588_v63 = vand.u32 4294901760, %v11428_v35 }
 0x143   :  { %9138 = vmatmul.mubr.f32.vlgmr.msra.gmra.mrb[8].mxu1 %v10539_v37  ;;  %9899 = vmatprep.subr.bf16.mxu0 %v10422_v0  ;;  %v11426_v39 = vsub.f32 %v6495_v49, %v6500_v23  ;;  %v11437_v24 = vsub.f32 %v6008_v41, %v6017_v51 }
 0x144   :  { %9934 = vmatpush3.bf16.msra.mxu1 %v11299_v22  ;;  %9214 = vmatprep.mubr.msk.f32.mxu1 %vm10423_vm0, %v10424_v1  ;;  %v11439_v60 = vsub.f32 %v6009_v31, %v6020_v52  ;;  %v10020_v31 = vpack.c.bf16 %v11448_v7, %v11446_v6 }
 0x145   :  { %9935 = vmatprep.subr.bf16.mxu1 %v10422_v0 }
 0x146   :  { %9901 = vmatpush3.bf16.msra.mxu0 %v11322_v53  ;;  %v9984_v41 = vpack.c.bf16 %v11439_v60, %v11437_v24 }
 0x147   :  { %9902 = vmatprep.subr.bf16.mxu0 %v10422_v0 }
 0x148   :  { %9937 = vmatpush3.bf16.msra.mxu1 %v11324_v34 }
 0x149   :  { %9938 = vmatprep.subr.bf16.mxu1 %v10422_v0  ;;  %9149 = vmatmul.mubr.f32.vlgmr.msra.gmra.mrb[10].mxu0 %v10584_v62 }
 0x14a   :  { %9904 = vmatpush3.bf16.msra.mxu0 %v9903_v61  ;;  %9159 = vmatprep.mubr.msk.f32.mxu0 %vm10423_vm0, %v10424_v1  ;;  %v6581_v61 = vand.u32 4294901760, %v11426_v39 }
 0x14b   :  { %9215 = vmatmul.mubr.f32.vlgmr.msra.gmra.mrb[10].mxu1 %v10590_v3  ;;  %9905 = vmatprep.subr.bf16.mxu0 %v10422_v0 }
 0x14c   :  { %9940 = vmatpush3.bf16.msra.mxu1 %v9939_v55  ;;  %9225 = vmatprep.mubr.msk.f32.mxu1 %vm10423_vm0, %v10424_v1 }
 0x14d   :  { %9941 = vmatprep.subr.bf16.mxu1 %v10422_v0 }
 0x14e   :  { %9907 = vmatpush3.bf16.msra.mxu0 %v9906_v8  ;;  %v11455_v8 = vpack.c.bf16 %v6014_v18, %v6011_v13 }
 0x14f   :  { %9908 = vmatprep.subr.bf16.mxu0 %v10422_v0 }
 0x150   :  { %9943 = vmatpush3.bf16.msra.mxu1 %v9942_v9  ;;  %v11457_v9 = vpack.c.bf16 %v6503_v15, %v6500_v23  ;;  %v9981_v15 = vpack.c.bf16 %v11424_v48, %v11422_v47 }
 0x151   :  { %9944 = vmatprep.subr.bf16.mxu1 %v10422_v0  ;;  %9160 = vmatmul.mubr.f32.vlgmr.msra.gmra.mrb[10].mxu0 %v10527_v30 }
 0x152   :  { %9910 = vmatpush3.bf16.msra.mxu0 %v9909_v2  ;;  %9170 = vmatprep.mubr.msk.f32.mxu0 %vm10423_vm0, %v10424_v1  ;;  %v6100_v2 = vsub.f32 %v11424_v48, %v6099_v58 }
 0x153   :  { %9226 = vmatmul.mubr.f32.vlgmr.msra.gmra.mrb[10].mxu1 %v10539_v37  ;;  %9911 = vmatprep.subr.bf16.mxu0 %v10422_v0 }
 0x154   :  { %9946 = vmatpush3.bf16.msra.mxu1 %v9945_v10  ;;  %v560_v14 = vpop.f32.mrb[0].mxu0  ;;  %9236 = vmatprep.mubr.msk.f32.mxu1 %vm10423_vm0, %v10424_v1  ;;  %v6106_v10 = vand.u32 4294901760, %v11437_v24 }
 0x155   :  { %9947 = vmatprep.subr.bf16.mxu1 %v10422_v0  ;;  %v8545_v16 = vpop.f32.mrb[1].mxu0 }
 0x156   :  { %v1052_v5 = vpop.f32.mrb[0].mxu1  ;;  %9913 = vmatpush3.bf16.msra.mxu0 %v9912_v11  ;;  %v6113_v11 = vand.u32 4294901760, %v11439_v60  ;;  %v11480_v16 = vpack.c.bf16 %v6020_v52, %v6017_v51 }
 0x157   :  { %v11377_v21 = vmul.f32 %v1052_v5, %v560_v14  ;;  %v8611_v27 = vpop.f32.mrb[1].mxu1  ;;  %9914 = vmatprep.subr.bf16.mxu0 %v10422_v0  ;;  %v6595_v14 = vand.u32 4294901760, %v11446_v6  ;;  %v6602_v5 = vand.u32 4294901760, %v11448_v7 }
 0x158   :  { %9949 = vmatpush3.bf16.msra.mxu1 %v9948_v12  ;;  %v6589_v12 = vsub.f32 %v11428_v35, %v6588_v63  ;;  %v6101_v27 = vand.u32 4294901760, %v6100_v2  ;;  %v6995_v2 = vld [vmem:[#allocation7 + $0x78] sm:$0xff] }
 0x159   :  { %v1058_v28 = vmul.f32 %v11377_v21, %v11377_v21  ;;  %9950 = vmatprep.subr.bf16.mxu1 %v10422_v0  ;;  %9171 = vmatmul.mubr.f32.vlgmr.msra.gmra.mrb[10].mxu0 %v10542_v38  ;;  %v1057_v4 = vmul.f32 0.5, %v11377_v21  ;;  %v6603_v44 = vsub.f32 %v11448_v7, %v6602_v5  ;;  %v7002_v48 = vand.u32 4294901760, %v6995_v2 }
 0x15a   :  { %9916 = vmatpush3.bf16.msra.mxu0 %v11297_v43  ;;  %9181 = vmatprep.mubr.msk.f32.mxu0 %vm10423_vm0, %v10424_v1 }
 0x15b   :  { %v1059_v19 = vmul.f32 0.035677407, %v1058_v28  ;;  %9237 = vmatmul.mubr.f32.vlgmr.msra.gmra.mrb[10].mxu1 %v10553_v42  ;;  %9917 = vmatprep.subr.bf16.mxu0 %v10422_v0  ;;  %v6107_v28 = vsub.f32 %v11437_v24, %v6106_v10  ;;  %v6604_v18 = vand.u32 4294901760, %v6603_v44  ;;  %v7485_v24 = vld [vmem:[#allocation8 + $0xb8] sm:$0xff] }
 0x15c   :  { %9952 = vmatpush3.bf16.msra.mxu1 %v11299_v22  ;;  %9247 = vmatprep.mubr.msk.f32.mxu1 %vm10423_vm0, %v10424_v1 }
 0x15d   :  { %v1060_v20 = vadd.f32 0.7978846, %v1059_v19  ;;  %9953 = vmatprep.subr.bf16.mxu1 %v10422_v0  ;;  %v6114_v19 = vsub.f32 %v11439_v60, %v6113_v11  ;;  %v7486_v60 = vld [vmem:[#allocation8 + $0xf8] sm:$0xff] }
 0x15e   :  { %9919 = vmatpush3.bf16.msra.mxu0 %v11322_v53 }
 0x15f   :  { %v1061_v32 = vmul.f32 %v1060_v20, %v11377_v21  ;;  %9920 = vmatprep.subr.bf16.mxu0 %v10422_v0  ;;  %v6115_v49 = vand.u32 4294901760, %v6114_v19 }
 0x160   :  { %9955 = vmatpush3.bf16.msra.mxu1 %v11324_v34 }
 0x161   :  { %10282 = vtanh.f32 %v1061_v32  ;;  %9956 = vmatprep.subr.bf16.mxu1 %v10422_v0  ;;  %9182 = vmatmul.mubr.f32.vlgmr.msra.gmra.mrb[10].mxu0 %v10560_v46  ;;  %v6590_v32 = vand.u32 4294901760, %v6589_v12  ;;  %v7483_v12 = vld [vmem:[#allocation8 + $0x38] sm:$0xff] }
 0x162   :  { %9922 = vmatpush3.bf16.msra.mxu0 %v9921_v33  ;;  %9192 = vmatprep.mubr.msk.f32.mxu0 %vm10423_vm0, %v10424_v1  ;;  %v6596_v33 = vsub.f32 %v11446_v6, %v6595_v14 }
 0x163   :  { %9248 = vmatmul.mubr.f32.vlgmr.msra.gmra.mrb[10].mxu1 %v10567_v50  ;;  %9923 = vmatprep.subr.bf16.mxu0 %v10422_v0 }
 0x164   :  { %9958 = vmatpush3.bf16.msra.mxu1 %v9957_v40  ;;  %9258 = vmatprep.mubr.msk.f32.mxu1 %vm10423_vm0, %v10424_v1  ;;  %v6108_v40 = vand.u32 4294901760, %v6107_v28  ;;  %v6597_v13 = vand.u32 4294901760, %v6596_v33  ;;  %v7497_v28 = vand.u32 4294901760, %v7486_v60 }
 0x165   :  { %9959 = vmatprep.subr.bf16.mxu1 %v10422_v0 }
 0x166   :  { %9925 = vmatpush3.bf16.msra.mxu0 %v9924_v29  ;;  %v9978_v29 = vpack.c.bf16 %v6115_v49, %v6108_v40  ;;  %v10014_v23 = vpack.c.bf16 %v6604_v18, %v6597_v13  ;;  %v11606_v18 = vsub.f32 %v7486_v60, %v7497_v28 }
 0x167   :  { %9926 = vmatprep.subr.bf16.mxu0 %v10422_v0 }
 0x168   :  { %9961 = vmatpush3.bf16.msra.mxu1 %v9960_v36  ;;  %v10017_v36 = vpack.c.bf16 %v11428_v35, %v11426_v39 }
 0x169   :  { %9962 = vmatprep.subr.bf16.mxu1 %v10422_v0  ;;  %9193 = vmatmul.mubr.f32.vlgmr.msra.gmra.mrb[10].mxu0 %v10527_v30 }
 0x16a   :  { %9928 = vmatpush3.bf16.msra.mxu0 %v11297_v43  ;;  %9203 = vmatprep.mubr.msk.f32.mxu0 %vm10423_vm0, %v10424_v1 }
 0x16b   :  { %v10283_v59 = vpop.eup %10282  ;;  %9259 = vmatmul.mubr.f32.vlgmr.msra.gmra.mrb[10].mxu1 %v10539_v37  ;;  %9929 = vmatprep.subr.bf16.mxu0 %v10422_v0 }
 0x16c   :  { %v1063_v55 = vadd.f32 1.0, %v10283_v59  ;;  %9964 = vmatpush3.bf16.msra.mxu1 %v11299_v22  ;;  %9269 = vmatprep.mubr.msk.f32.mxu1 %vm10423_vm0, %v10424_v1  ;;  %v6093_v22 = vsub.f32 %v11422_v47, %v6092_v57 }
 0x16d   :  { %9965 = vmatprep.subr.bf16.mxu1 %v10422_v0 }
 0x16e   :  { %v1064_v43 = vmul.f32 %v1063_v55, %v1057_v4  ;;  %9931 = vmatpush3.bf16.msra.mxu0 %v11322_v53  ;;  %v6582_v53 = vsub.f32 %v11426_v39, %v6581_v61  ;;  %v6094_v21 = vand.u32 4294901760, %v6093_v22  ;;  %v6994_v22 = vld [vmem:[#allocation7 + $0x38] sm:$0xff]  ;;  %v9996_v39 = vpack.c.bf16 %v6113_v11, %v6106_v10 }
 0x16f   :  { %9968 = vmatprep.subr.bf16.mxu0 %v10422_v0  ;;  %v6999_v47 = vand.u32 4294901760, %v6994_v22  ;;  %v11582_v11 = vsub.f32 %v6995_v2, %v7002_v48 }
 0x170   :  { %1065 = vst [vmem:[#allocation10] sm:$0xff] %v1064_v43  ;;  %9967 = vmatpush3.bf16.msra.mxu1 %v11324_v34  ;;  %v11482_v34 = vpack.c.bf16 %v6509_v56, %v6506_v17  ;;  %v6583_v20 = vand.u32 4294901760, %v6582_v53  ;;  %v9975_v45 = vpack.c.bf16 %v6101_v27, %v6094_v21  ;;  %v9993_v43 = vpack.c.bf16 %v6099_v58, %v6092_v57  ;;  %v7484_v21 = vld [vmem:[#allocation8 + $0x78] sm:$0xff] }
 0x171   :  { %10004 = vmatprep.subr.bf16.mxu1 %v10422_v0  ;;  %9204 = vmatmul.mubr.f32.vlgmr.msra.gmra.mrb[10].mxu0 %v10527_v30  ;;  %v10029_v53 = vpack.c.bf16 %v6588_v63, %v6581_v61  ;;  %v7488_v57 = vand.u32 4294901760, %v7483_v12  ;;  %v7491_v35 = vand.u32 4294901760, %v7484_v21  ;;  %v10032_v58 = vpack.c.bf16 %v6602_v5, %v6595_v14  ;;  %v6996_v61 = vld [vmem:[#allocation7 + $0xb8] sm:$0xff] }
 0x172   :  { %9970 = vmatpush3.bf16.msra.mxu0 %v11455_v8  ;;  %9280 = vmatprep.mubr.msk.f32.mxu0 %vm10423_vm0, %v10424_v1  ;;  %v10011_v54 = vpack.c.bf16 %v6590_v32, %v6583_v20  ;;  %v6997_v63 = vld [vmem:[#allocation7 + $0xf8] sm:$0xff]  ;;  %v11580_v10 = vsub.f32 %v6994_v22, %v6999_v47  ;;  %v7005_v14 = vand.u32 4294901760, %v6996_v61  ;;  %v7494_v27 = vand.u32 4294901760, %v7485_v24 }
 0x173   :  { %9270 = vmatmul.mubr.f32.vlgmr.msra.gmra.mrb[10].mxu1 %v10539_v37  ;;  %9971 = vmatprep.subr.bf16.mxu0 %v10422_v0  ;;  %v11584_v6 = vsub.f32 %v7483_v12, %v7488_v57  ;;  %v11586_v7 = vsub.f32 %v7484_v21, %v7491_v35  ;;  %v7008_v5 = vand.u32 4294901760, %v6997_v63  ;;  %v7087_v20 = vand.u32 4294901760, %v11582_v11 }
 0x174   :  { %10006 = vmatpush3.bf16.msra.mxu1 %v11457_v9  ;;  %9346 = vmatprep.mubr.msk.f32.mxu1 %vm10423_vm0, %v10424_v1  ;;  %v7080_v19 = vand.u32 4294901760, %v11580_v10  ;;  %v11595_v33 = vsub.f32 %v6996_v61, %v7005_v14  ;;  %v11604_v13 = vsub.f32 %v7485_v24, %v7494_v27 }
 0x175   :  { %10007 = vmatprep.subr.bf16.mxu1 %v10422_v0  ;;  %v11597_v44 = vsub.f32 %v6997_v63, %v7008_v5  ;;  %v7576_v40 = vand.u32 4294901760, %v11586_v7 }
 0x176   :  { %9973 = vmatpush3.bf16.msra.mxu0 %v11480_v16 }
 0x177   :  { %9974 = vmatprep.subr.bf16.mxu0 %v10422_v0 }
 0x178   :  { %10009 = vmatpush3.bf16.msra.mxu1 %v11482_v34 }
 0x179   :  { %10010 = vmatprep.subr.bf16.mxu1 %v10422_v0  ;;  %9281 = vmatmul.mubr.f32.vlgmr.msra.gmra.mrb[12].mxu0 %v10584_v62 }
 0x17a   :  { %9976 = vmatpush3.bf16.msra.mxu0 %v9975_v45  ;;  %9291 = vmatprep.mubr.msk.f32.mxu0 %vm10423_vm0, %v10424_v1  ;;  %v7569_v45 = vand.u32 4294901760, %v11584_v6 }
 0x17b   :  { %9347 = vmatmul.mubr.f32.vlgmr.msra.gmra.mrb[12].mxu1 %v10590_v3  ;;  %9977 = vmatprep.subr.bf16.mxu0 %v10422_v0 }
 0x17c   :  { %10012 = vmatpush3.bf16.msra.mxu1 %v10011_v54  ;;  %9357 = vmatprep.mubr.msk.f32.mxu1 %vm10423_vm0, %v10424_v1 }
 0x17d   :  { %10013 = vmatprep.subr.bf16.mxu1 %v10422_v0 }
 0x17e   :  { %9979 = vmatpush3.bf16.msra.mxu0 %v9978_v29  ;;  %v11613_v29 = vpack.c.bf16 %v7002_v48, %v6999_v47 }
 0x17f   :  { %9980 = vmatprep.subr.bf16.mxu0 %v10422_v0 }
 0x180   :  { %10015 = vmatpush3.bf16.msra.mxu1 %v10014_v23  ;;  %v11615_v23 = vpack.c.bf16 %v7491_v35, %v7488_v57  ;;  %v10056_v35 = vpack.c.bf16 %v11597_v44, %v11595_v33 }
 0x181   :  { %10016 = vmatprep.subr.bf16.mxu1 %v10422_v0  ;;  %9292 = vmatmul.mubr.f32.vlgmr.msra.gmra.mrb[12].mxu0 %v10527_v30 }
 0x182   :  { %9982 = vmatpush3.bf16.msra.mxu0 %v9981_v15  ;;  %9302 = vmatprep.mubr.msk.f32.mxu0 %vm10423_vm0, %v10424_v1  ;;  %v7088_v15 = vsub.f32 %v11582_v11, %v7087_v20 }
 0x183   :  { %9358 = vmatmul.mubr.f32.vlgmr.msra.gmra.mrb[12].mxu1 %v10539_v37  ;;  %9983 = vmatprep.subr.bf16.mxu0 %v10422_v0 }
 0x184   :  { %10018 = vmatpush3.bf16.msra.mxu1 %v10017_v36  ;;  %v1551_v25 = vpop.f32.mrb[2].mxu0  ;;  %9368 = vmatprep.mubr.msk.f32.mxu1 %vm10423_vm0, %v10424_v1  ;;  %v7094_v36 = vand.u32 4294901760, %v11595_v33 }
 0x185   :  { %10019 = vmatprep.subr.bf16.mxu1 %v10422_v0  ;;  %v8677_v51 = vpop.f32.mrb[3].mxu0 }
 0x186   :  { %v2040_v26 = vpop.f32.mrb[2].mxu1  ;;  %9985 = vmatpush3.bf16.msra.mxu0 %v9984_v41  ;;  %v7101_v41 = vand.u32 4294901760, %v11597_v44  ;;  %v11638_v51 = vpack.c.bf16 %v7008_v5, %v7005_v14 }
 0x187   :  { %v11535_v52 = vmul.f32 %v2040_v26, %v1551_v25  ;;  %v8743_v17 = vpop.f32.mrb[3].mxu1  ;;  %9986 = vmatprep.subr.bf16.mxu0 %v10422_v0  ;;  %v7583_v25 = vand.u32 4294901760, %v11604_v13  ;;  %v7590_v26 = vand.u32 4294901760, %v11606_v18 }
 0x188   :  { %10021 = vmatpush3.bf16.msra.mxu1 %v10020_v31  ;;  %v7577_v31 = vsub.f32 %v11586_v7, %v7576_v40  ;;  %v7089_v17 = vand.u32 4294901760, %v7088_v15 }
 0x189   :  { %v2046_v56 = vmul.f32 %v11535_v52, %v11535_v52  ;;  %10022 = vmatprep.subr.bf16.mxu1 %v10422_v0  ;;  %9303 = vmatmul.mubr.f32.vlgmr.msra.gmra.mrb[12].mxu0 %v10542_v38  ;;  %v2045_v49 = vmul.f32 0.5, %v11535_v52  ;;  %v7591_v22 = vsub.f32 %v11606_v18, %v7590_v26 }
 0x18a   :  { %9988 = vmatpush3.bf16.msra.mxu0 %v11455_v8  ;;  %9313 = vmatprep.mubr.msk.f32.mxu0 %vm10423_vm0, %v10424_v1 }
 0x18b   :  { %v2047_v59 = vmul.f32 0.035677407, %v2046_v56  ;;  %9369 = vmatmul.mubr.f32.vlgmr.msra.gmra.mrb[12].mxu1 %v10553_v42  ;;  %9989 = vmatprep.subr.bf16.mxu0 %v10422_v0  ;;  %v7095_v56 = vsub.f32 %v11595_v33, %v7094_v36  ;;  %v7592_v48 = vand.u32 4294901760, %v7591_v22 }
 0x18c   :  { %10024 = vmatpush3.bf16.msra.mxu1 %v11457_v9  ;;  %9379 = vmatprep.mubr.msk.f32.mxu1 %vm10423_vm0, %v10424_v1 }
 0x18d   :  { %v2048_v4 = vadd.f32 0.7978846, %v2047_v59  ;;  %10025 = vmatprep.subr.bf16.mxu1 %v10422_v0  ;;  %v7102_v59 = vsub.f32 %v11597_v44, %v7101_v41 }
 0x18e   :  { %9991 = vmatpush3.bf16.msra.mxu0 %v11480_v16 }
 0x18f   :  { %v2049_v55 = vmul.f32 %v2048_v4, %v11535_v52  ;;  %9992 = vmatprep.subr.bf16.mxu0 %v10422_v0  ;;  %v7103_v12 = vand.u32 4294901760, %v7102_v59 }
 0x190   :  { %10027 = vmatpush3.bf16.msra.mxu1 %v11482_v34 }
 0x191   :  { %10284 = vtanh.f32 %v2049_v55  ;;  %10028 = vmatprep.subr.bf16.mxu1 %v10422_v0  ;;  %9314 = vmatmul.mubr.f32.vlgmr.msra.gmra.mrb[12].mxu0 %v10560_v46  ;;  %v7578_v55 = vand.u32 4294901760, %v7577_v31 }
 0x192   :  { %9994 = vmatpush3.bf16.msra.mxu0 %v9993_v43  ;;  %9324 = vmatprep.mubr.msk.f32.mxu0 %vm10423_vm0, %v10424_v1  ;;  %v7584_v43 = vsub.f32 %v11604_v13, %v7583_v25 }
 0x193   :  { %9380 = vmatmul.mubr.f32.vlgmr.msra.gmra.mrb[12].mxu1 %v10567_v50  ;;  %9995 = vmatprep.subr.bf16.mxu0 %v10422_v0 }
 0x194   :  { %10030 = vmatpush3.bf16.msra.mxu1 %v10029_v53  ;;  %9390 = vmatprep.mubr.msk.f32.mxu1 %vm10423_vm0, %v10424_v1  ;;  %v7096_v53 = vand.u32 4294901760, %v7095_v56  ;;  %v7585_v47 = vand.u32 4294901760, %v7584_v43 }
 0x195   :  { %10031 = vmatprep.subr.bf16.mxu1 %v10422_v0 }
 0x196   :  { %9997 = vmatpush3.bf16.msra.mxu0 %v9996_v39  ;;  %v10050_v39 = vpack.c.bf16 %v7103_v12, %v7096_v53  ;;  %v10086_v57 = vpack.c.bf16 %v7592_v48, %v7585_v47 }
 0x197   :  { %9998 = vmatprep.subr.bf16.mxu0 %v10422_v0 }
 0x198   :  { %10033 = vmatpush3.bf16.msra.mxu1 %v10032_v58  ;;  %v10092_v58 = vpack.c.bf16 %v11606_v18, %v11604_v13 }
 0x199   :  { %10034 = vmatprep.subr.bf16.mxu1 %v10422_v0  ;;  %9325 = vmatmul.mubr.f32.vlgmr.msra.gmra.mrb[12].mxu0 %v10527_v30 }
 0x19a   :  { %10000 = vmatpush3.bf16.msra.mxu0 %v11455_v8  ;;  %9335 = vmatprep.mubr.msk.f32.mxu0 %vm10423_vm0, %v10424_v1 }
 0x19b   :  { %v10285_v32 = vpop.eup %10284  ;;  %9391 = vmatmul.mubr.f32.vlgmr.msra.gmra.mrb[12].mxu1 %v10539_v37  ;;  %10001 = vmatprep.subr.bf16.mxu0 %v10422_v0 }
 0x19c   :  { %v2051_v54 = vadd.f32 1.0, %v10285_v32  ;;  %10036 = vmatpush3.bf16.msra.mxu1 %v11457_v9  ;;  %9401 = vmatprep.mubr.msk.f32.mxu1 %vm10423_vm0, %v10424_v1  ;;  %v7081_v9 = vsub.f32 %v11580_v10, %v7080_v19 }
 0x19d   :  { %10037 = vmatprep.subr.bf16.mxu1 %v10422_v0 }
 0x19e   :  { %v2052_v8 = vmul.f32 %v2051_v54, %v2045_v49  ;;  %10003 = vmatpush3.bf16.msra.mxu0 %v11480_v16  ;;  %v7570_v16 = vsub.f32 %v11584_v6, %v7569_v45  ;;  %v7082_v52 = vand.u32 4294901760, %v7081_v9 }
 0x19f   :  { %10040 = vmatprep.subr.bf16.mxu0 %v10422_v0 }
 0x1a0   :  { %2053 = vst [vmem:[#allocation10 + $0x8] sm:$0xff] %v2052_v8  ;;  %10039 = vmatpush3.bf16.msra.mxu1 %v11482_v34  ;;  %v11640_v34 = vpack.c.bf16 %v7497_v28, %v7494_v27  ;;  %v7571_v4 = vand.u32 4294901760, %v7570_v16  ;;  %v10047_v2 = vpack.c.bf16 %v7089_v17, %v7082_v52 }
 0x1a1   :  { %10076 = vmatprep.subr.bf16.mxu1 %v10422_v0  ;;  %9336 = vmatmul.mubr.f32.vlgmr.msra.gmra.mrb[12].mxu0 %v10527_v30 }
 0x1a2   :  { %10042 = vmatpush3.bf16.msra.mxu0 %v11613_v29  ;;  %9412 = vmatprep.mubr.msk.f32.mxu0 %vm10423_vm0, %v10424_v1  ;;  %v10083_v21 = vpack.c.bf16 %v7578_v55, %v7571_v4 }
 0x1a3   :  { %9402 = vmatmul.mubr.f32.vlgmr.msra.gmra.mrb[12].mxu1 %v10539_v37  ;;  %10043 = vmatprep.subr.bf16.mxu0 %v10422_v0 }
 0x1a4   :  { %10078 = vmatpush3.bf16.msra.mxu1 %v11615_v23  ;;  %9478 = vmatprep.mubr.msk.f32.mxu1 %vm10423_vm0, %v10424_v1 }
 0x1a5   :  { %10079 = vmatprep.subr.bf16.mxu1 %v10422_v0 }
 0x1a6   :  { %10045 = vmatpush3.bf16.msra.mxu0 %v11638_v51 }
 0x1a7   :  { %10046 = vmatprep.subr.bf16.mxu0 %v10422_v0 }
 0x1a8   :  { %10081 = vmatpush3.bf16.msra.mxu1 %v11640_v34 }
 0x1a9   :  { %10082 = vmatprep.subr.bf16.mxu1 %v10422_v0  ;;  %9413 = vmatmul.mubr.f32.vlgmr.msra.gmra.mrb[14].mxu0 %v10584_v62  ;;  %v10053_v62 = vpack.c.bf16 %v11582_v11, %v11580_v10  ;;  %v10068_v10 = vpack.c.bf16 %v7101_v41, %v7094_v36  ;;  %v10104_v11 = vpack.c.bf16 %v7590_v26, %v7583_v25 }
 0x1aa   :  { %10048 = vmatpush3.bf16.msra.mxu0 %v10047_v2  ;;  %9423 = vmatprep.mubr.msk.f32.mxu0 %vm10423_vm0, %v10424_v1 }
 0x1ab   :  { %9479 = vmatmul.mubr.f32.vlgmr.msra.gmra.mrb[14].mxu1 %v10590_v3  ;;  %10049 = vmatprep.subr.bf16.mxu0 %v10422_v0  ;;  %v10089_v3 = vpack.c.bf16 %v11586_v7, %v11584_v6 }
 0x1ac   :  { %10084 = vmatpush3.bf16.msra.mxu1 %v10083_v21  ;;  %9489 = vmatprep.mubr.msk.f32.mxu1 %vm10423_vm0, %v10424_v1 }
 0x1ad   :  { %10085 = vmatprep.subr.bf16.mxu1 %v10422_v0 }
 0x1ae   :  { %10051 = vmatpush3.bf16.msra.mxu0 %v10050_v39 }
 0x1af   :  { %10052 = vmatprep.subr.bf16.mxu0 %v10422_v0 }
 0x1b0   :  { %10087 = vmatpush3.bf16.msra.mxu1 %v10086_v57 }
 0x1b1   :  { %10088 = vmatprep.subr.bf16.mxu1 %v10422_v0  ;;  %9424 = vmatmul.mubr.f32.vlgmr.msra.gmra.mrb[14].mxu0 %v10527_v30 }
 0x1b2   :  { %10054 = vmatpush3.bf16.msra.mxu0 %v10053_v62  ;;  %9434 = vmatprep.mubr.msk.f32.mxu0 %vm10423_vm0, %v10424_v1 }
 0x1b3   :  { %9490 = vmatmul.mubr.f32.vlgmr.msra.gmra.mrb[14].mxu1 %v10539_v37  ;;  %10055 = vmatprep.subr.bf16.mxu0 %v10422_v0 }
 0x1b4   :  { %10090 = vmatpush3.bf16.msra.mxu1 %v10089_v3  ;;  %v2539_v61 = vpop.f32.mrb[4].mxu0  ;;  %9500 = vmatprep.mubr.msk.f32.mxu1 %vm10423_vm0, %v10424_v1 }
 0x1b5   :  { %10091 = vmatprep.subr.bf16.mxu1 %v10422_v0  ;;  %v8809_v24 = vpop.f32.mrb[5].mxu0 }
 0x1b6   :  { %v3028_v63 = vpop.f32.mrb[4].mxu1  ;;  %10057 = vmatpush3.bf16.msra.mxu0 %v10056_v35 }
 0x1b7   :  { %v3032_v60 = vmul.f32 %v3028_v63, %v2539_v61  ;;  %v8875_v14 = vpop.f32.mrb[5].mxu1  ;;  %10058 = vmatprep.subr.bf16.mxu0 %v10422_v0 }
 0x1b8   :  { %10093 = vmatpush3.bf16.msra.mxu1 %v10092_v58 }
 0x1b9   :  { %v3034_v5 = vmul.f32 %v3032_v60, %v3032_v60  ;;  %10094 = vmatprep.subr.bf16.mxu1 %v10422_v0  ;;  %9435 = vmatmul.mubr.f32.vlgmr.msra.gmra.mrb[14].mxu0 %v10542_v38  ;;  %v10065_v38 = vpack.c.bf16 %v7087_v20, %v7080_v19 }
 0x1ba   :  { %10060 = vmatpush3.bf16.msra.mxu0 %v11613_v29  ;;  %9445 = vmatprep.mubr.msk.f32.mxu0 %vm10423_vm0, %v10424_v1 }
 0x1bb   :  { %v3035_v27 = vmul.f32 0.035677407, %v3034_v5  ;;  %9501 = vmatmul.mubr.f32.vlgmr.msra.gmra.mrb[14].mxu1 %v10553_v42  ;;  %10061 = vmatprep.subr.bf16.mxu0 %v10422_v0  ;;  %v10101_v42 = vpack.c.bf16 %v7576_v40, %v7569_v45 }
 0x1bc   :  { %10096 = vmatpush3.bf16.msra.mxu1 %v11615_v23  ;;  %9511 = vmatprep.mubr.msk.f32.mxu1 %vm10423_vm0, %v10424_v1 }
 0x1bd   :  { %v3036_v28 = vadd.f32 0.7978846, %v3035_v27  ;;  %10097 = vmatprep.subr.bf16.mxu1 %v10422_v0 }
 0x1be   :  { %10063 = vmatpush3.bf16.msra.mxu0 %v11638_v51 }
 0x1bf   :  { %v3037_v32 = vmul.f32 %v3036_v28, %v3032_v60  ;;  %10064 = vmatprep.subr.bf16.mxu0 %v10422_v0 }
 0x1c0   :  { %10099 = vmatpush3.bf16.msra.mxu1 %v11640_v34 }
 0x1c1   :  { %10286 = vtanh.f32 %v3037_v32  ;;  %10100 = vmatprep.subr.bf16.mxu1 %v10422_v0  ;;  %9446 = vmatmul.mubr.f32.vlgmr.msra.gmra.mrb[14].mxu0 %v10560_v46 }
 0x1c2   :  { %10066 = vmatpush3.bf16.msra.mxu0 %v10065_v38  ;;  %9456 = vmatprep.mubr.msk.f32.mxu0 %vm10423_vm0, %v10424_v1 }
 0x1c3   :  { %9512 = vmatmul.mubr.f32.vlgmr.msra.gmra.mrb[14].mxu1 %v10567_v50  ;;  %10067 = vmatprep.subr.bf16.mxu0 %v10422_v0  ;;  %v3033_v50 = vmul.f32 0.5, %v3032_v60 }
 0x1c4   :  { %10102 = vmatpush3.bf16.msra.mxu1 %v10101_v42  ;;  %9522 = vmatprep.mubr.msk.f32.mxu1 %vm10423_vm0, %v10424_v1 }
 0x1c5   :  { %10103 = vmatprep.subr.bf16.mxu1 %v10422_v0 }
 0x1c6   :  { %10069 = vmatpush3.bf16.msra.mxu0 %v10068_v10 }
 0x1c7   :  { %10070 = vmatprep.subr.bf16.mxu0 %v10422_v0 }
 0x1c8   :  { %10105 = vmatpush3.bf16.msra.mxu1 %v10104_v11 }
 0x1c9   :  { %10106 = vmatprep.subr.bf16.mxu1 %v10422_v0  ;;  %9457 = vmatmul.mubr.f32.vlgmr.msra.gmra.mrb[14].mxu0 %v10527_v30 }
 0x1ca   :  { %10072 = vmatpush3.bf16.msra.mxu0 %v11613_v29  ;;  %9467 = vmatprep.mubr.msk.f32.mxu0 %vm10423_vm0, %v10424_v1 }
 0x1cb   :  { %v10287_v46 = vpop.eup %10286  ;;  %9523 = vmatmul.mubr.f32.vlgmr.msra.gmra.mrb[14].mxu1 %v10539_v37  ;;  %10073 = vmatprep.subr.bf16.mxu0 %v10422_v0 }
 0x1cc   :  { %v3039_v6 = vadd.f32 1.0, %v10287_v46  ;;  %10108 = vmatpush3.bf16.msra.mxu1 %v11615_v23  ;;  %9533 = vmatprep.mubr.msk.f32.mxu1 %vm10423_vm0, %v10424_v1 }
 0x1cd   :  { %10109 = vmatprep.subr.bf16.mxu1 %v10422_v0 }
 0x1ce   :  { %v3040_v7 = vmul.f32 %v3039_v6, %v3033_v50  ;;  %10075 = vmatpush3.bf16.msra.mxu0 %v11638_v51 }
 0x1d0   :  { %3041 = vst [vmem:[#allocation10 + $0x10] sm:$0xff] %v3040_v7  ;;  %10111 = vmatpush3.bf16.msra.mxu1 %v11640_v34 }
 0x1d1   :  { %9468 = vmatmul.mubr.f32.vlgmr.msra.gmra.mrb[14].mxu0 %v10527_v30 }
 0x1d3   :  { %9534 = vmatmul.mubr.f32.vlgmr.msra.gmra.mrb[14].mxu1 %v10539_v37 }
 0x1e4   :  { %v3527_v19 = vpop.f32.mrb[6].mxu0 }
 0x1e5   :  { %v8941_v33 = vpop.f32.mrb[7].mxu0 }
 0x1e6   :  { %v4016_v20 = vpop.f32.mrb[6].mxu1 }
 0x1e7   :  { %v4020_v0 = vmul.f32 %v4016_v20, %v3527_v19  ;;  %v9007_v44 = vpop.f32.mrb[7].mxu1 }
 0x1e9   :  { %v4022_v45 = vmul.f32 %v4020_v0, %v4020_v0  ;;  %v4021_v13 = vmul.f32 0.5, %v4020_v0 }
 0x1eb   :  { %v4023_v40 = vmul.f32 0.035677407, %v4022_v45 }
 0x1ed   :  { %v4024_v49 = vadd.f32 0.7978846, %v4023_v40 }
 0x1ef   :  { %v4025_v54 = vmul.f32 %v4024_v49, %v4020_v0 }
 0x1f1   :  { %10288 = vtanh.f32 %v4025_v54 }
 0x1fb   :  { %v10289_v1 = vpop.eup %10288 }
 0x1fc   :  { %v4027_v18 = vadd.f32 1.0, %v10289_v1 }
 0x1fe   :  { %v4028_v8 = vmul.f32 %v4027_v18, %v4021_v13 }
 0x200   :  { %4029 = vst [vmem:[#allocation10 + $0x18] sm:$0xff] %v4028_v8 }
 0x214   :  { %v4515_v29 = vpop.f32.mrb[8].mxu0 }
 0x215   :  { %v9073_v30 = vpop.f32.mrb[9].mxu0 }
 0x216   :  { %v5004_v23 = vpop.f32.mrb[8].mxu1 }
 0x217   :  { %v5008_v9 = vmul.f32 %v5004_v23, %v4515_v29  ;;  %v9139_v37 = vpop.f32.mrb[9].mxu1 }
 0x219   :  { %v5010_v15 = vmul.f32 %v5008_v9, %v5008_v9  ;;  %v5009_v25 = vmul.f32 0.5, %v5008_v9 }
 0x21b   :  { %v5011_v36 = vmul.f32 0.035677407, %v5010_v15 }
 0x21d   :  { %v5012_v41 = vadd.f32 0.7978846, %v5011_v36 }
 0x21f   :  { %v5013_v16 = vmul.f32 %v5012_v41, %v5008_v9 }
 0x221   :  { %10290 = vtanh.f32 %v5013_v16 }
 0x22b   :  { %v10291_v31 = vpop.eup %10290 }
 0x22c   :  { %v5015_v26 = vadd.f32 1.0, %v10291_v31 }
 0x22e   :  { %v5016_v51 = vmul.f32 %v5015_v26, %v5009_v25 }
 0x230   :  { %5017 = vst [vmem:[#allocation10 + $0x20] sm:$0xff] %v5016_v51 }
 0x244   :  { %v5503_v34 = vpop.f32.mrb[10].mxu0 }
 0x245   :  { %v9205_v17 = vpop.f32.mrb[11].mxu0 }
 0x246   :  { %v5992_v52 = vpop.f32.mrb[10].mxu1 }
 0x247   :  { %v5996_v56 = vmul.f32 %v5992_v52, %v5503_v34  ;;  %v9271_v59 = vpop.f32.mrb[11].mxu1 }
 0x249   :  { %v5998_v4 = vmul.f32 %v5996_v56, %v5996_v56  ;;  %v5997_v53 = vmul.f32 0.5, %v5996_v56 }
 0x24b   :  { %v5999_v55 = vmul.f32 0.035677407, %v5998_v4 }
 0x24d   :  { %v6000_v43 = vadd.f32 0.7978846, %v5999_v55 }
 0x24f   :  { %v6001_v22 = vmul.f32 %v6000_v43, %v5996_v56 }
 0x251   :  { %10292 = vtanh.f32 %v6001_v22 }
 0x25b   :  { %v10293_v2 = vpop.eup %10292 }
 0x25c   :  { %v6003_v12 = vadd.f32 1.0, %v10293_v2 }
 0x25e   :  { %v6004_v21 = vmul.f32 %v6003_v12, %v5997_v53 }
 0x260   :  { %6005 = vst [vmem:[#allocation10 + $0x28] sm:$0xff] %v6004_v21 }
 0x274   :  { %v6491_v47 = vpop.f32.mrb[12].mxu0 }
 0x275   :  { %v9337_v39 = vpop.f32.mrb[13].mxu0 }
 0x276   :  { %v6980_v48 = vpop.f32.mrb[12].mxu1 }
 0x277   :  { %v6984_v57 = vmul.f32 %v6980_v48, %v6491_v47  ;;  %v9403_v62 = vpop.f32.mrb[13].mxu1 }
 0x279   :  { %v6986_v3 = vmul.f32 %v6984_v57, %v6984_v57  ;;  %v6985_v24 = vmul.f32 0.5, %v6984_v57 }
 0x27b   :  { %v6987_v35 = vmul.f32 0.035677407, %v6986_v3 }
 0x27d   :  { %v6988_v58 = vadd.f32 0.7978846, %v6987_v35 }
 0x27f   :  { %v6989_v61 = vmul.f32 %v6988_v58, %v6984_v57 }
 0x281   :  { %10294 = vtanh.f32 %v6989_v61 }
 0x28b   :  { %v10295_v63 = vpop.eup %10294 }
 0x28c   :  { %v6991_v60 = vadd.f32 1.0, %v10295_v63 }
 0x28e   :  { %v6992_v14 = vmul.f32 %v6991_v60, %v6985_v24 }
 0x290   :  { %6993 = vst [vmem:[#allocation10 + $0x30] sm:$0xff] %v6992_v14 }
 0x2a4   :  { %v7479_v5 = vpop.f32.mrb[14].mxu0 }
 0x2a5   :  { %v9469_v28 = vpop.f32.mrb[15].mxu0 }
 0x2a6   :  { %v7968_v27 = vpop.f32.mrb[14].mxu1 }
 0x2a7   :  { %v7972_v32 = vmul.f32 %v7968_v27, %v7479_v5  ;;  %v9535_v38 = vpop.f32.mrb[15].mxu1 }
 0x2a9   :  { %v7974_v42 = vmul.f32 %v7972_v32, %v7972_v32  ;;  %v7973_v6 = vmul.f32 0.5, %v7972_v32 }
 0x2ab   :  { %v7975_v10 = vmul.f32 0.035677407, %v7974_v42 }
 0x2ad   :  { %v7976_v11 = vadd.f32 0.7978846, %v7975_v10 }
 0x2af   :  { %v7977_v46 = vmul.f32 %v7976_v11, %v7972_v32 }
 0x2b1   :  { %10296 = vtanh.f32 %v7977_v46 }
 0x2bb   :  { %v10297_v50 = vpop.eup %10296 }
 0x2bc   :  { %v7979_v7 = vadd.f32 1.0, %v10297_v50 }
 0x2be   :  { %v7980_v19 = vmul.f32 %v7979_v7, %v7973_v6 }
 0x2c0   :  { %7982 = vst.msk [vmem:[#allocation10 + $0x38] sm:$0xff] %vm7981_vm2, %v7980_v19 }
 0x2c1   :  { %10397 = shalt.err (!%p10394_p8)
}
 0x2c2   :  { %s10398_s13 = scalar_lea.hbm %s11765_s4, 1024 }
 0x2c3   :  { %p10399_p9 = scmp.ne.s32.totalorder %s11765_s4, %s10398_s13  ;;  %p10402_p10 = scmp.lt.u32.totalorder %s10398_s13, %s11765_s4 }
 0x2c5   :  { %p10404_p11 = pnand %p10402_p10, %p10399_p9 }
 0x2c7   :  { %10407 = shalt.err (!%p10404_p11)
}
 0x2c8   :  { %7992 = dma.vmem_to_hbm [thread:$0]  %s7990_s10, 1024, %s11765_s4, [#allocation4]  }
 0x2c9   :  { %10414 = dma.done.wait [#allocation4], 1024  }
 0x2ca   :  { %10415 = vsyncadd [#allocation4], 4294966272 }
 0x2cb   :  { %7996 = vsyncpa [#allocation3], 1 }
 0x2cc   :  { %7997 = vsyncpa [#allocation6], 1 }
 0x2cd   :  { %7998 = vsyncpa [#allocation9], 1 }
 0x2ce   :  { %7999 = vsyncpa [#allocation4], 1 }

</bundles_post_ra>
